<compile_context>
chip_gen: v7x
topology: tpu7x:2x2x1
jax: 0.10.0
libtpu: 0.0.40
codegen_flags: <defaults>
</compile_context>

<pallas_src>
import functools
import re

import jax
import jax.numpy as jnp
from jax import lax
from jax.experimental import pallas as pl
from jax.experimental.pallas import tpu as pltpu

EPS = 1e-5  # nn.LayerNorm default


def _round_up(n, m):
    return ((n + m - 1) // m) * m


def _cdiv(a, b):
    return (a + b - 1) // b


def _tpu_generation():
    try:
        kind = jax.devices()[0].device_kind  # e.g. "TPU v5 lite", "TPU v6e"
        m = re.search(r"v(\d+)", kind)
        if m:
            return int(m.group(1))
    except Exception:
        pass
    return 0


def _vmem_capacity_bytes(gen):
    try:
        info = pltpu.get_tpu_info()
        cap = int(getattr(info, "vmem_capacity_bytes", 0) or 0)
        if cap > 0:
            return cap
    except Exception:
        pass
    return (64 << 20) if gen >= 7 else (128 << 20)


def _mlp_kernel(x_ref, w1_ref, w2_ref, w3_ref, p_ref, o_ref, *, inv_d):
    """x_ref: (tm, d_in_p) bf16; w*: (*, d_out_p) bf16;
    p_ref: (16, d_out_p) f32 with rows 3*l+{0,1,2} = bias/gamma/beta of layer l;
    o_ref: (tm, d_out_p) f32."""

    def layer(h, w_ref, li):
        # Linear on the MXU: bf16 x bf16 -> f32 accumulate. Padded rows/cols of W
        # and padded bias lanes are zero, so z's padded lanes are exactly zero.
        z = jnp.dot(h.astype(w_ref.dtype), w_ref[...],
                    preferred_element_type=jnp.float32)
        z = z + p_ref[3 * li + 0:3 * li + 1, :]                 # + bias (f32)
        # Single-pass LayerNorm over the real features (pad lanes contribute 0).
        s1 = jnp.sum(z, axis=-1, keepdims=True)
        s2 = jnp.sum(z * z, axis=-1, keepdims=True)
        mu = s1 * inv_d
        var = jnp.maximum(s2 * inv_d - mu * mu, 0.0)
        zn = (z - mu) * lax.rsqrt(var + EPS)
        zn = zn * p_ref[3 * li + 1:3 * li + 2, :] + p_ref[3 * li + 2:3 * li + 3, :]
        return jnp.maximum(zn, 0.0)   # ReLU; gamma=beta=0 on pads -> pads stay 0

    h = layer(x_ref[...], w1_ref, 0)       # x already bf16
    h = layer(h, w2_ref, 1)
    h = layer(h, w3_ref, 2)
    o_ref[...] = h.astype(o_ref.dtype)


def mlp_forward(x, params, *, compute_dtype=jnp.bfloat16):
    """x: (B, input_size) float32; params: PyTorch-convention dict
    (w{i}: (out, in), b{i}/g{i}/be{i}: (out,))."""
    B, d_in = x.shape
    d_out = params["w1"].shape[0]

    gen = _tpu_generation()
    align = 256 if gen >= 6 else 128          # v6e/v7x MXUs are 256x256
    d_in_p = _round_up(d_in, align)
    d_out_p = _round_up(d_out, align)

    wbytes = jnp.dtype(compute_dtype).itemsize
    weight_bytes = (d_in_p + 2 * d_out_p) * d_out_p * wbytes
    param_bytes = 16 * d_out_p * 4

    vmem_cap = _vmem_capacity_bytes(gen)
    usable = int(vmem_cap * 0.85)             # headroom for Mosaic's own scratch
    if weight_bytes + param_bytes > usable:
        # TODO(synk): add an N-tiled (emit_pipeline) weight fallback for very large
        # hidden sizes (mainly v7x's 64 MiB VMEM) instead of failing.
        raise ValueError(
            f"resident weights ({(weight_bytes + param_bytes) / 2**20:.1f} MiB) "
            f"exceed the VMEM budget ({usable / 2**20:.1f} MiB)")

    # --- batch tiling --------------------------------------------------------
    max_tile = 512 if vmem_cap >= (96 << 20) else 256   # bigger tiles on v5e/v6e
    min_tiles = 2 if gen >= 7 else 1                    # keep both v7x TCs busy

    def tile_bytes(tm):
        # double-buffered bf16 x tile + double-buffered f32 out tile + ~4 f32
        # (tm, d_out_p) temporaries live inside the body.
        return (2 * tm * d_in_p * wbytes
                + 2 * tm * d_out_p * 4
                + 4 * tm * d_out_p * 4)

    n_tiles = max(_cdiv(B, max_tile), min_tiles)
    tm = _round_up(_cdiv(B, n_tiles), 16)     # 16 sublanes: safe for bf16 packing
    while tm > 16 and weight_bytes + param_bytes + tile_bytes(tm) > usable:
        tm = _round_up(tm // 2, 16)
    b_pad = _round_up(B, tm)
    grid = (b_pad // tm,)

    vmem_limit = int(min(
        max(weight_bytes + param_bytes + tile_bytes(tm) + (4 << 20), 16 << 20),
        usable))

    # --- operand prep (pad to lane-dense tiles, pre-transpose, pre-cast) -----
    x_p = jnp.pad(x.astype(compute_dtype),
                  ((0, b_pad - B), (0, d_in_p - d_in)))          # bf16 streamed input

    def prep_w(i, in_p):
        w = params[f"w{i}"].T.astype(jnp.float32)                # (in, out)
        w = jnp.pad(w, ((0, in_p - w.shape[0]), (0, d_out_p - w.shape[1])))
        return w.astype(compute_dtype)                           # bf16 MXU operand

    w1 = prep_w(1, d_in_p)
    w2 = prep_w(2, d_out_p)
    w3 = prep_w(3, d_out_p)

    # One packed (16, d_out_p) f32 param array: rows 3l+{0,1,2} = b/g/be of layer l.
    rows = []
    for i in (1, 2, 3):
        for name in (f"b{i}", f"g{i}", f"be{i}"):
            rows.append(params[name].astype(jnp.float32))
    p_all = jnp.pad(jnp.stack(rows), ((0, 16 - 9), (0, d_out_p - d_out)))

    kernel = functools.partial(_mlp_kernel, inv_d=1.0 / d_out)

    def run(single_buffer_weights):
        def const_spec(shape):
            kwargs = {}
            if single_buffer_weights:
                kwargs["pipeline_mode"] = pl.Buffered(1)   # constant index_map -> 1 buffer
            return pl.BlockSpec(shape, lambda i: (0,) * len(shape), **kwargs)

        out_p = pl.pallas_call(
            kernel,
            out_shape=jax.ShapeDtypeStruct((b_pad, d_out_p), jnp.float32),
            grid=grid,
            in_specs=[
                pl.BlockSpec((tm, d_in_p), lambda i: (i, 0)),    # x tile (streamed bf16)
                const_spec((d_in_p, d_out_p)),                   # W1 (VMEM-resident)
                const_spec((d_out_p, d_out_p)),                  # W2
                const_spec((d_out_p, d_out_p)),                  # W3
                const_spec((16, d_out_p)),                       # packed b/g/be (f32)
            ],
            out_specs=pl.BlockSpec((tm, d_out_p), lambda i: (i, 0)),
            compiler_params=pltpu.CompilerParams(
                dimension_semantics=("parallel",),
                vmem_limit_bytes=vmem_limit),
        )(x_p, w1, w2, w3, p_all)
        return jax.block_until_ready(out_p)

    try:
        out_p = run(True)     # single-buffered constant weight/param specs
    except Exception:
        out_p = run(False)    # pipeline_mode not supported on this jax version

    return out_p[:B, :d_out]


def _reference(x, params):
    """Pure-JAX f32 reference mirroring the PyTorch forward."""
    h = x
    for i in (1, 2, 3):
        w, b = params[f"w{i}"], params[f"b{i}"]
        g, be = params[f"g{i}"], params[f"be{i}"]
        z = h @ w.T + b
        mu = jnp.mean(z, axis=-1, keepdims=True)
        var = jnp.mean((z - mu) ** 2, axis=-1, keepdims=True)
        zn = (z - mu) / jnp.sqrt(var + EPS)
        h = jnp.maximum(zn * g + be, 0.0)
    return h


if __name__ == "__main__":
    batch = 8
    input_size = 32
    output_size = 32

    key = jax.random.PRNGKey(0)
    keys = jax.random.split(key, 8)

    x = jax.random.normal(keys[0], (batch, input_size), dtype=jnp.float32)

    params = {
        "w1": jax.random.normal(keys[1], (output_size, input_size), jnp.float32) * 0.1,
        "b1": jax.random.normal(keys[2], (output_size,), jnp.float32) * 0.1,
        "g1": jnp.ones((output_size,), jnp.float32),
        "be1": jnp.zeros((output_size,), jnp.float32),
        "w2": jax.random.normal(keys[3], (output_size, output_size), jnp.float32) * 0.1,
        "b2": jax.random.normal(keys[4], (output_size,), jnp.float32) * 0.1,
        "g2": jnp.ones((output_size,), jnp.float32),
        "be2": jnp.zeros((output_size,), jnp.float32),
        "w3": jax.random.normal(keys[5], (output_size, output_size), jnp.float32) * 0.1,
        "b3": jax.random.normal(keys[6], (output_size,), jnp.float32) * 0.1,
        "g3": jnp.ones((output_size,), jnp.float32),
        "be3": jnp.zeros((output_size,), jnp.float32),
    }

    out = mlp_forward(x, params)
    out = jax.block_until_ready(out)

    ref = _reference(x, params)
    assert out.shape == (batch, output_size)
    # Tolerance loosened for bf16 MXU operands / bf16-streamed x (LN math stays f32).
    assert jnp.allclose(out, ref, atol=5e-2, rtol=5e-2), "mismatch vs reference"

    print("KERNEL_OK")
</pallas_src>

<mosaic_0001>
module attributes {stable_mosaic.version = 11 : i64} {
  func.func @_mlp_kernel(%arg0: i32, %arg1: memref<16x128xbf16, #tpu.memory_space<vmem>>, %arg2: memref<128x128xbf16, #tpu.memory_space<vmem>>, %arg3: memref<128x128xbf16, #tpu.memory_space<vmem>>, %arg4: memref<128x128xbf16, #tpu.memory_space<vmem>>, %arg5: memref<16x128xf32, #tpu.memory_space<vmem>>, %arg6: memref<16x128xf32, #tpu.memory_space<vmem>>) attributes {dimension_semantics = [#tpu.dimension_semantics<parallel>], iteration_bounds = array<i64: 1>, scalar_prefetch = 0 : i64, scratch_operands = 0 : i64, tpu.core_type = #tpu.core_type<tc>, window_params = [{transform_indices = @transform_0, window_bounds = array<i64: 16, 128>}, {pipeline_mode = #tpu.pipeline_mode<synchronous>, transform_indices = @transform_1, window_bounds = array<i64: 128, 128>}, {pipeline_mode = #tpu.pipeline_mode<synchronous>, transform_indices = @transform_2, window_bounds = array<i64: 128, 128>}, {pipeline_mode = #tpu.pipeline_mode<synchronous>, transform_indices = @transform_3, window_bounds = array<i64: 128, 128>}, {pipeline_mode = #tpu.pipeline_mode<synchronous>, transform_indices = @transform_4, window_bounds = array<i64: 16, 128>}, {transform_indices = @transform_5, window_bounds = array<i64: 16, 128>}]} {
    %c0 = arith.constant 0 : index
    %c0_0 = arith.constant 0 : index
    %0 = vector.load %arg1[%c0, %c0_0] : memref<16x128xbf16, #tpu.memory_space<vmem>>, vector<16x128xbf16>
    %c0_1 = arith.constant 0 : index
    %c0_2 = arith.constant 0 : index
    %1 = vector.load %arg2[%c0_1, %c0_2] : memref<128x128xbf16, #tpu.memory_space<vmem>>, vector<128x128xbf16>
    %cst = arith.constant dense<0.000000e+00> : vector<16x128xf32>
    %2 = tpu.matmul %0, %1, %cst {dimension_numbers = #tpu.dot_dimension_numbers<[1], [0], [0], [1], [0, 0, 1, 1], [], []>} : vector<16x128xbf16>, vector<128x128xbf16>, vector<16x128xf32> -> vector<16x128xf32>
    %c0_3 = arith.constant 0 : index
    %c0_4 = arith.constant 0 : index
    %3 = vector.load %arg5[%c0_3, %c0_4] : memref<16x128xf32, #tpu.memory_space<vmem>>, vector<1x128xf32>
    %4 = vector.broadcast %3 : vector<1x128xf32> to vector<16x128xf32>
    %5 = arith.addf %2, %4 : vector<16x128xf32>
    %cst_5 = arith.constant dense<0.000000e+00> : vector<16xf32>
    %6 = vector.multi_reduction <add>, %5, %cst_5 [1] : vector<16x128xf32> to vector<16xf32>
    %7 = vector.shape_cast %6 : vector<16xf32> to vector<16x1xf32>
    %8 = arith.mulf %5, %5 : vector<16x128xf32>
    %cst_6 = arith.constant dense<0.000000e+00> : vector<16xf32>
    %9 = vector.multi_reduction <add>, %8, %cst_6 [1] : vector<16x128xf32> to vector<16xf32>
    %10 = vector.shape_cast %9 : vector<16xf32> to vector<16x1xf32>
    %cst_7 = arith.constant 3.125000e-02 : f32
    %11 = vector.broadcast %cst_7 : f32 to vector<16x1xf32>
    %12 = arith.mulf %7, %11 : vector<16x1xf32>
    %cst_8 = arith.constant 3.125000e-02 : f32
    %13 = vector.broadcast %cst_8 : f32 to vector<16x1xf32>
    %14 = arith.mulf %10, %13 : vector<16x1xf32>
    %15 = arith.mulf %12, %12 : vector<16x1xf32>
    %16 = arith.subf %14, %15 : vector<16x1xf32>
    %cst_9 = arith.constant 0.000000e+00 : f32
    %17 = vector.broadcast %cst_9 : f32 to vector<16x1xf32>
    %18 = arith.maximumf %16, %17 : vector<16x1xf32>
    %19 = vector.broadcast %12 : vector<16x1xf32> to vector<16x128xf32>
    %20 = arith.subf %5, %19 : vector<16x128xf32>
    %cst_10 = arith.constant 9.99999974E-6 : f32
    %21 = vector.broadcast %cst_10 : f32 to vector<16x1xf32>
    %22 = arith.addf %18, %21 : vector<16x1xf32>
    %23 = math.rsqrt %22 : vector<16x1xf32>
    %24 = vector.broadcast %23 : vector<16x1xf32> to vector<16x128xf32>
    %25 = arith.mulf %20, %24 : vector<16x128xf32>
    %c1 = arith.constant 1 : index
    %c0_11 = arith.constant 0 : index
    %26 = vector.load %arg5[%c1, %c0_11] : memref<16x128xf32, #tpu.memory_space<vmem>>, vector<1x128xf32>
    %27 = vector.broadcast %26 : vector<1x128xf32> to vector<16x128xf32>
    %28 = arith.mulf %25, %27 : vector<16x128xf32>
    %c2 = arith.constant 2 : index
    %c0_12 = arith.constant 0 : index
    %29 = vector.load %arg5[%c2, %c0_12] : memref<16x128xf32, #tpu.memory_space<vmem>>, vector<1x128xf32>
    %30 = vector.broadcast %29 : vector<1x128xf32> to vector<16x128xf32>
    %31 = arith.addf %28, %30 : vector<16x128xf32>
    %cst_13 = arith.constant 0.000000e+00 : f32
    %32 = vector.broadcast %cst_13 : f32 to vector<16x128xf32>
    %33 = arith.maximumf %31, %32 : vector<16x128xf32>
    %34 = arith.truncf %33 : vector<16x128xf32> to vector<16x128xbf16>
    %c0_14 = arith.constant 0 : index
    %c0_15 = arith.constant 0 : index
    %35 = vector.load %arg3[%c0_14, %c0_15] : memref<128x128xbf16, #tpu.memory_space<vmem>>, vector<128x128xbf16>
    %cst_16 = arith.constant dense<0.000000e+00> : vector<16x128xf32>
    %36 = tpu.matmul %34, %35, %cst_16 {dimension_numbers = #tpu.dot_dimension_numbers<[1], [0], [0], [1], [0, 0, 1, 1], [], []>} : vector<16x128xbf16>, vector<128x128xbf16>, vector<16x128xf32> -> vector<16x128xf32>
    %c3 = arith.constant 3 : index
    %c0_17 = arith.constant 0 : index
    %37 = vector.load %arg5[%c3, %c0_17] : memref<16x128xf32, #tpu.memory_space<vmem>>, vector<1x128xf32>
    %38 = vector.broadcast %37 : vector<1x128xf32> to vector<16x128xf32>
    %39 = arith.addf %36, %38 : vector<16x128xf32>
    %cst_18 = arith.constant dense<0.000000e+00> : vector<16xf32>
    %40 = vector.multi_reduction <add>, %39, %cst_18 [1] : vector<16x128xf32> to vector<16xf32>
    %41 = vector.shape_cast %40 : vector<16xf32> to vector<16x1xf32>
    %42 = arith.mulf %39, %39 : vector<16x128xf32>
    %cst_19 = arith.constant dense<0.000000e+00> : vector<16xf32>
    %43 = vector.multi_reduction <add>, %42, %cst_19 [1] : vector<16x128xf32> to vector<16xf32>
    %44 = vector.shape_cast %43 : vector<16xf32> to vector<16x1xf32>
    %cst_20 = arith.constant 3.125000e-02 : f32
    %45 = vector.broadcast %cst_20 : f32 to vector<16x1xf32>
    %46 = arith.mulf %41, %45 : vector<16x1xf32>
    %cst_21 = arith.constant 3.125000e-02 : f32
    %47 = vector.broadcast %cst_21 : f32 to vector<16x1xf32>
    %48 = arith.mulf %44, %47 : vector<16x1xf32>
    %49 = arith.mulf %46, %46 : vector<16x1xf32>
    %50 = arith.subf %48, %49 : vector<16x1xf32>
    %cst_22 = arith.constant 0.000000e+00 : f32
    %51 = vector.broadcast %cst_22 : f32 to vector<16x1xf32>
    %52 = arith.maximumf %50, %51 : vector<16x1xf32>
    %53 = vector.broadcast %46 : vector<16x1xf32> to vector<16x128xf32>
    %54 = arith.subf %39, %53 : vector<16x128xf32>
    %cst_23 = arith.constant 9.99999974E-6 : f32
    %55 = vector.broadcast %cst_23 : f32 to vector<16x1xf32>
    %56 = arith.addf %52, %55 : vector<16x1xf32>
    %57 = math.rsqrt %56 : vector<16x1xf32>
    %58 = vector.broadcast %57 : vector<16x1xf32> to vector<16x128xf32>
    %59 = arith.mulf %54, %58 : vector<16x128xf32>
    %c4 = arith.constant 4 : index
    %c0_24 = arith.constant 0 : index
    %60 = vector.load %arg5[%c4, %c0_24] : memref<16x128xf32, #tpu.memory_space<vmem>>, vector<1x128xf32>
    %61 = vector.broadcast %60 : vector<1x128xf32> to vector<16x128xf32>
    %62 = arith.mulf %59, %61 : vector<16x128xf32>
    %c5 = arith.constant 5 : index
    %c0_25 = arith.constant 0 : index
    %63 = vector.load %arg5[%c5, %c0_25] : memref<16x128xf32, #tpu.memory_space<vmem>>, vector<1x128xf32>
    %64 = vector.broadcast %63 : vector<1x128xf32> to vector<16x128xf32>
    %65 = arith.addf %62, %64 : vector<16x128xf32>
    %cst_26 = arith.constant 0.000000e+00 : f32
    %66 = vector.broadcast %cst_26 : f32 to vector<16x128xf32>
    %67 = arith.maximumf %65, %66 : vector<16x128xf32>
    %68 = arith.truncf %67 : vector<16x128xf32> to vector<16x128xbf16>
    %c0_27 = arith.constant 0 : index
    %c0_28 = arith.constant 0 : index
    %69 = vector.load %arg4[%c0_27, %c0_28] : memref<128x128xbf16, #tpu.memory_space<vmem>>, vector<128x128xbf16>
    %cst_29 = arith.constant dense<0.000000e+00> : vector<16x128xf32>
    %70 = tpu.matmul %68, %69, %cst_29 {dimension_numbers = #tpu.dot_dimension_numbers<[1], [0], [0], [1], [0, 0, 1, 1], [], []>} : vector<16x128xbf16>, vector<128x128xbf16>, vector<16x128xf32> -> vector<16x128xf32>
    %c6 = arith.constant 6 : index
    %c0_30 = arith.constant 0 : index
    %71 = vector.load %arg5[%c6, %c0_30] : memref<16x128xf32, #tpu.memory_space<vmem>>, vector<1x128xf32>
    %72 = vector.broadcast %71 : vector<1x128xf32> to vector<16x128xf32>
    %73 = arith.addf %70, %72 : vector<16x128xf32>
    %cst_31 = arith.constant dense<0.000000e+00> : vector<16xf32>
    %74 = vector.multi_reduction <add>, %73, %cst_31 [1] : vector<16x128xf32> to vector<16xf32>
    %75 = vector.shape_cast %74 : vector<16xf32> to vector<16x1xf32>
    %76 = arith.mulf %73, %73 : vector<16x128xf32>
    %cst_32 = arith.constant dense<0.000000e+00> : vector<16xf32>
    %77 = vector.multi_reduction <add>, %76, %cst_32 [1] : vector<16x128xf32> to vector<16xf32>
    %78 = vector.shape_cast %77 : vector<16xf32> to vector<16x1xf32>
    %cst_33 = arith.constant 3.125000e-02 : f32
    %79 = vector.broadcast %cst_33 : f32 to vector<16x1xf32>
    %80 = arith.mulf %75, %79 : vector<16x1xf32>
    %cst_34 = arith.constant 3.125000e-02 : f32
    %81 = vector.broadcast %cst_34 : f32 to vector<16x1xf32>
    %82 = arith.mulf %78, %81 : vector<16x1xf32>
    %83 = arith.mulf %80, %80 : vector<16x1xf32>
    %84 = arith.subf %82, %83 : vector<16x1xf32>
    %cst_35 = arith.constant 0.000000e+00 : f32
    %85 = vector.broadcast %cst_35 : f32 to vector<16x1xf32>
    %86 = arith.maximumf %84, %85 : vector<16x1xf32>
    %87 = vector.broadcast %80 : vector<16x1xf32> to vector<16x128xf32>
    %88 = arith.subf %73, %87 : vector<16x128xf32>
    %cst_36 = arith.constant 9.99999974E-6 : f32
    %89 = vector.broadcast %cst_36 : f32 to vector<16x1xf32>
    %90 = arith.addf %86, %89 : vector<16x1xf32>
    %91 = math.rsqrt %90 : vector<16x1xf32>
    %92 = vector.broadcast %91 : vector<16x1xf32> to vector<16x128xf32>
    %93 = arith.mulf %88, %92 : vector<16x128xf32>
    %c7 = arith.constant 7 : index
    %c0_37 = arith.constant 0 : index
    %94 = vector.load %arg5[%c7, %c0_37] : memref<16x128xf32, #tpu.memory_space<vmem>>, vector<1x128xf32>
    %95 = vector.broadcast %94 : vector<1x128xf32> to vector<16x128xf32>
    %96 = arith.mulf %93, %95 : vector<16x128xf32>
    %c8 = arith.constant 8 : index
    %c0_38 = arith.constant 0 : index
    %97 = vector.load %arg5[%c8, %c0_38] : memref<16x128xf32, #tpu.memory_space<vmem>>, vector<1x128xf32>
    %98 = vector.broadcast %97 : vector<1x128xf32> to vector<16x128xf32>
    %99 = arith.addf %96, %98 : vector<16x128xf32>
    %cst_39 = arith.constant 0.000000e+00 : f32
    %100 = vector.broadcast %cst_39 : f32 to vector<16x128xf32>
    %101 = arith.maximumf %99, %100 : vector<16x128xf32>
    %c0_40 = arith.constant 0 : index
    %c0_41 = arith.constant 0 : index
    %102 = vector.load %arg6[%c0_40, %c0_41] : memref<16x128xf32, #tpu.memory_space<vmem>>, vector<16x128xf32>
    tpu.vector_store %arg6[%c0_40, %c0_41], %101 {strides = array<i32>} : memref<16x128xf32, #tpu.memory_space<vmem>>, vector<16x128xf32>,
    return
  }
  func.func @transform_0(%arg0: i32) -> (i32, i32) {
    %c0_i32 = arith.constant 0 : i32
    %c0_i32_0 = arith.constant 0 : i32
    return %arg0, %c0_i32 : i32, i32
  }
  func.func @transform_1(%arg0: i32) -> (i32, i32) {
    %c0_i32 = arith.constant 0 : i32
    %c0_i32_0 = arith.constant 0 : i32
    %c0_i32_1 = arith.constant 0 : i32
    return %c0_i32, %c0_i32_0 : i32, i32
  }
  func.func @transform_2(%arg0: i32) -> (i32, i32) {
    %c0_i32 = arith.constant 0 : i32
    %c0_i32_0 = arith.constant 0 : i32
    %c0_i32_1 = arith.constant 0 : i32
    return %c0_i32, %c0_i32_0 : i32, i32
  }
  func.func @transform_3(%arg0: i32) -> (i32, i32) {
    %c0_i32 = arith.constant 0 : i32
    %c0_i32_0 = arith.constant 0 : i32
    %c0_i32_1 = arith.constant 0 : i32
    return %c0_i32, %c0_i32_0 : i32, i32
  }
  func.func @transform_4(%arg0: i32) -> (i32, i32) {
    %c0_i32 = arith.constant 0 : i32
    %c0_i32_0 = arith.constant 0 : i32
    %c0_i32_1 = arith.constant 0 : i32
    return %c0_i32, %c0_i32_0 : i32, i32
  }
  func.func @transform_5(%arg0: i32) -> (i32, i32) {
    %c0_i32 = arith.constant 0 : i32
    %c0_i32_0 = arith.constant 0 : i32
    return %arg0, %c0_i32 : i32, i32
  }
}

module attributes {stable_mosaic.version = 11 : i64} {
  func.func @_mlp_kernel(%arg0: i32, %arg1: memref<16x128xbf16, #tpu.memory_space<vmem>>, %arg2: memref<128x128xbf16, #tpu.memory_space<vmem>>, %arg3: memref<128x128xbf16, #tpu.memory_space<vmem>>, %arg4: memref<128x128xbf16, #tpu.memory_space<vmem>>, %arg5: memref<16x128xf32, #tpu.memory_space<vmem>>, %arg6: memref<16x128xf32, #tpu.memory_space<vmem>>) attributes {dimension_semantics = [#tpu.dimension_semantics<parallel>], iteration_bounds = array<i64: 1>, scalar_prefetch = 0 : i64, scratch_operands = 0 : i64, tpu.core_type = #tpu.core_type<tc>, window_params = [{transform_indices = @transform_0, window_bounds = array<i64: 16, 128>}, {pipeline_mode = #tpu.pipeline_mode<synchronous>, transform_indices = @transform_1, window_bounds = array<i64: 128, 128>}, {pipeline_mode = #tpu.pipeline_mode<synchronous>, transform_indices = @transform_2, window_bounds = array<i64: 128, 128>}, {pipeline_mode = #tpu.pipeline_mode<synchronous>, transform_indices = @transform_3, window_bounds = array<i64: 128, 128>}, {pipeline_mode = #tpu.pipeline_mode<synchronous>, transform_indices = @transform_4, window_bounds = array<i64: 16, 128>}, {transform_indices = @transform_5, window_bounds = array<i64: 16, 128>}]} {
    %c0 = arith.constant 0 : index
    %c0_0 = arith.constant 0 : index
    %0 = vector.load %arg1[%c0, %c0_0] : memref<16x128xbf16, #tpu.memory_space<vmem>>, vector<16x128xbf16>
    %c0_1 = arith.constant 0 : index
    %c0_2 = arith.constant 0 : index
    %1 = vector.load %arg2[%c0_1, %c0_2] : memref<128x128xbf16, #tpu.memory_space<vmem>>, vector<128x128xbf16>
    %cst = arith.constant dense<0.000000e+00> : vector<16x128xf32>
    %2 = tpu.matmul %0, %1, %cst {dimension_numbers = #tpu.dot_dimension_numbers<[1], [0], [0], [1], [0, 0, 1, 1], [], []>} : vector<16x128xbf16>, vector<128x128xbf16>, vector<16x128xf32> -> vector<16x128xf32>
    %c0_3 = arith.constant 0 : index
    %c0_4 = arith.constant 0 : index
    %3 = vector.load %arg5[%c0_3, %c0_4] : memref<16x128xf32, #tpu.memory_space<vmem>>, vector<1x128xf32>
    %4 = vector.broadcast %3 : vector<1x128xf32> to vector<16x128xf32>
    %5 = arith.addf %2, %4 : vector<16x128xf32>
    %cst_5 = arith.constant dense<0.000000e+00> : vector<16xf32>
    %6 = vector.multi_reduction <add>, %5, %cst_5 [1] : vector<16x128xf32> to vector<16xf32>
    %7 = vector.shape_cast %6 : vector<16xf32> to vector<16x1xf32>
    %8 = arith.mulf %5, %5 : vector<16x128xf32>
    %cst_6 = arith.constant dense<0.000000e+00> : vector<16xf32>
    %9 = vector.multi_reduction <add>, %8, %cst_6 [1] : vector<16x128xf32> to vector<16xf32>
    %10 = vector.shape_cast %9 : vector<16xf32> to vector<16x1xf32>
    %cst_7 = arith.constant 3.125000e-02 : f32
    %11 = vector.broadcast %cst_7 : f32 to vector<16x1xf32>
    %12 = arith.mulf %7, %11 : vector<16x1xf32>
    %cst_8 = arith.constant 3.125000e-02 : f32
    %13 = vector.broadcast %cst_8 : f32 to vector<16x1xf32>
    %14 = arith.mulf %10, %13 : vector<16x1xf32>
    %15 = arith.mulf %12, %12 : vector<16x1xf32>
    %16 = arith.subf %14, %15 : vector<16x1xf32>
    %cst_9 = arith.constant 0.000000e+00 : f32
    %17 = vector.broadcast %cst_9 : f32 to vector<16x1xf32>
    %18 = arith.maximumf %16, %17 : vector<16x1xf32>
    %19 = vector.broadcast %12 : vector<16x1xf32> to vector<16x128xf32>
    %20 = arith.subf %5, %19 : vector<16x128xf32>
    %cst_10 = arith.constant 9.99999974E-6 : f32
    %21 = vector.broadcast %cst_10 : f32 to vector<16x1xf32>
    %22 = arith.addf %18, %21 : vector<16x1xf32>
    %23 = math.rsqrt %22 : vector<16x1xf32>
    %24 = vector.broadcast %23 : vector<16x1xf32> to vector<16x128xf32>
    %25 = arith.mulf %20, %24 : vector<16x128xf32>
    %c1 = arith.constant 1 : index
    %c0_11 = arith.constant 0 : index
    %26 = vector.load %arg5[%c1, %c0_11] : memref<16x128xf32, #tpu.memory_space<vmem>>, vector<1x128xf32>
    %27 = vector.broadcast %26 : vector<1x128xf32> to vector<16x128xf32>
    %28 = arith.mulf %25, %27 : vector<16x128xf32>
    %c2 = arith.constant 2 : index
    %c0_12 = arith.constant 0 : index
    %29 = vector.load %arg5[%c2, %c0_12] : memref<16x128xf32, #tpu.memory_space<vmem>>, vector<1x128xf32>
    %30 = vector.broadcast %29 : vector<1x128xf32> to vector<16x128xf32>
    %31 = arith.addf %28, %30 : vector<16x128xf32>
    %cst_13 = arith.constant 0.000000e+00 : f32
    %32 = vector.broadcast %cst_13 : f32 to vector<16x128xf32>
    %33 = arith.maximumf %31, %32 : vector<16x128xf32>
    %34 = arith.truncf %33 : vector<16x128xf32> to vector<16x128xbf16>
    %c0_14 = arith.constant 0 : index
    %c0_15 = arith.constant 0 : index
    %35 = vector.load %arg3[%c0_14, %c0_15] : memref<128x128xbf16, #tpu.memory_space<vmem>>, vector<128x128xbf16>
    %cst_16 = arith.constant dense<0.000000e+00> : vector<16x128xf32>
    %36 = tpu.matmul %34, %35, %cst_16 {dimension_numbers = #tpu.dot_dimension_numbers<[1], [0], [0], [1], [0, 0, 1, 1], [], []>} : vector<16x128xbf16>, vector<128x128xbf16>, vector<16x128xf32> -> vector<16x128xf32>
    %c3 = arith.constant 3 : index
    %c0_17 = arith.constant 0 : index
    %37 = vector.load %arg5[%c3, %c0_17] : memref<16x128xf32, #tpu.memory_space<vmem>>, vector<1x128xf32>
    %38 = vector.broadcast %37 : vector<1x128xf32> to vector<16x128xf32>
    %39 = arith.addf %36, %38 : vector<16x128xf32>
    %cst_18 = arith.constant dense<0.000000e+00> : vector<16xf32>
    %40 = vector.multi_reduction <add>, %39, %cst_18 [1] : vector<16x128xf32> to vector<16xf32>
    %41 = vector.shape_cast %40 : vector<16xf32> to vector<16x1xf32>
    %42 = arith.mulf %39, %39 : vector<16x128xf32>
    %cst_19 = arith.constant dense<0.000000e+00> : vector<16xf32>
    %43 = vector.multi_reduction <add>, %42, %cst_19 [1] : vector<16x128xf32> to vector<16xf32>
    %44 = vector.shape_cast %43 : vector<16xf32> to vector<16x1xf32>
    %cst_20 = arith.constant 3.125000e-02 : f32
    %45 = vector.broadcast %cst_20 : f32 to vector<16x1xf32>
    %46 = arith.mulf %41, %45 : vector<16x1xf32>
    %cst_21 = arith.constant 3.125000e-02 : f32
    %47 = vector.broadcast %cst_21 : f32 to vector<16x1xf32>
    %48 = arith.mulf %44, %47 : vector<16x1xf32>
    %49 = arith.mulf %46, %46 : vector<16x1xf32>
    %50 = arith.subf %48, %49 : vector<16x1xf32>
    %cst_22 = arith.constant 0.000000e+00 : f32
    %51 = vector.broadcast %cst_22 : f32 to vector<16x1xf32>
    %52 = arith.maximumf %50, %51 : vector<16x1xf32>
    %53 = vector.broadcast %46 : vector<16x1xf32> to vector<16x128xf32>
    %54 = arith.subf %39, %53 : vector<16x128xf32>
    %cst_23 = arith.constant 9.99999974E-6 : f32
    %55 = vector.broadcast %cst_23 : f32 to vector<16x1xf32>
    %56 = arith.addf %52, %55 : vector<16x1xf32>
    %57 = math.rsqrt %56 : vector<16x1xf32>
    %58 = vector.broadcast %57 : vector<16x1xf32> to vector<16x128xf32>
    %59 = arith.mulf %54, %58 : vector<16x128xf32>
    %c4 = arith.constant 4 : index
    %c0_24 = arith.constant 0 : index
    %60 = vector.load %arg5[%c4, %c0_24] : memref<16x128xf32, #tpu.memory_space<vmem>>, vector<1x128xf32>
    %61 = vector.broadcast %60 : vector<1x128xf32> to vector<16x128xf32>
    %62 = arith.mulf %59, %61 : vector<16x128xf32>
    %c5 = arith.constant 5 : index
    %c0_25 = arith.constant 0 : index
    %63 = vector.load %arg5[%c5, %c0_25] : memref<16x128xf32, #tpu.memory_space<vmem>>, vector<1x128xf32>
    %64 = vector.broadcast %63 : vector<1x128xf32> to vector<16x128xf32>
    %65 = arith.addf %62, %64 : vector<16x128xf32>
    %cst_26 = arith.constant 0.000000e+00 : f32
    %66 = vector.broadcast %cst_26 : f32 to vector<16x128xf32>
    %67 = arith.maximumf %65, %66 : vector<16x128xf32>
    %68 = arith.truncf %67 : vector<16x128xf32> to vector<16x128xbf16>
    %c0_27 = arith.constant 0 : index
    %c0_28 = arith.constant 0 : index
    %69 = vector.load %arg4[%c0_27, %c0_28] : memref<128x128xbf16, #tpu.memory_space<vmem>>, vector<128x128xbf16>
    %cst_29 = arith.constant dense<0.000000e+00> : vector<16x128xf32>
    %70 = tpu.matmul %68, %69, %cst_29 {dimension_numbers = #tpu.dot_dimension_numbers<[1], [0], [0], [1], [0, 0, 1, 1], [], []>} : vector<16x128xbf16>, vector<128x128xbf16>, vector<16x128xf32> -> vector<16x128xf32>
    %c6 = arith.constant 6 : index
    %c0_30 = arith.constant 0 : index
    %71 = vector.load %arg5[%c6, %c0_30] : memref<16x128xf32, #tpu.memory_space<vmem>>, vector<1x128xf32>
    %72 = vector.broadcast %71 : vector<1x128xf32> to vector<16x128xf32>
    %73 = arith.addf %70, %72 : vector<16x128xf32>
    %cst_31 = arith.constant dense<0.000000e+00> : vector<16xf32>
    %74 = vector.multi_reduction <add>, %73, %cst_31 [1] : vector<16x128xf32> to vector<16xf32>
    %75 = vector.shape_cast %74 : vector<16xf32> to vector<16x1xf32>
    %76 = arith.mulf %73, %73 : vector<16x128xf32>
    %cst_32 = arith.constant dense<0.000000e+00> : vector<16xf32>
    %77 = vector.multi_reduction <add>, %76, %cst_32 [1] : vector<16x128xf32> to vector<16xf32>
    %78 = vector.shape_cast %77 : vector<16xf32> to vector<16x1xf32>
    %cst_33 = arith.constant 3.125000e-02 : f32
    %79 = vector.broadcast %cst_33 : f32 to vector<16x1xf32>
    %80 = arith.mulf %75, %79 : vector<16x1xf32>
    %cst_34 = arith.constant 3.125000e-02 : f32
    %81 = vector.broadcast %cst_34 : f32 to vector<16x1xf32>
    %82 = arith.mulf %78, %81 : vector<16x1xf32>
    %83 = arith.mulf %80, %80 : vector<16x1xf32>
    %84 = arith.subf %82, %83 : vector<16x1xf32>
    %cst_35 = arith.constant 0.000000e+00 : f32
    %85 = vector.broadcast %cst_35 : f32 to vector<16x1xf32>
    %86 = arith.maximumf %84, %85 : vector<16x1xf32>
    %87 = vector.broadcast %80 : vector<16x1xf32> to vector<16x128xf32>
    %88 = arith.subf %73, %87 : vector<16x128xf32>
    %cst_36 = arith.constant 9.99999974E-6 : f32
    %89 = vector.broadcast %cst_36 : f32 to vector<16x1xf32>
    %90 = arith.addf %86, %89 : vector<16x1xf32>
    %91 = math.rsqrt %90 : vector<16x1xf32>
    %92 = vector.broadcast %91 : vector<16x1xf32> to vector<16x128xf32>
    %93 = arith.mulf %88, %92 : vector<16x128xf32>
    %c7 = arith.constant 7 : index
    %c0_37 = arith.constant 0 : index
    %94 = vector.load %arg5[%c7, %c0_37] : memref<16x128xf32, #tpu.memory_space<vmem>>, vector<1x128xf32>
    %95 = vector.broadcast %94 : vector<1x128xf32> to vector<16x128xf32>
    %96 = arith.mulf %93, %95 : vector<16x128xf32>
    %c8 = arith.constant 8 : index
    %c0_38 = arith.constant 0 : index
    %97 = vector.load %arg5[%c8, %c0_38] : memref<16x128xf32, #tpu.memory_space<vmem>>, vector<1x128xf32>
    %98 = vector.broadcast %97 : vector<1x128xf32> to vector<16x128xf32>
    %99 = arith.addf %96, %98 : vector<16x128xf32>
    %cst_39 = arith.constant 0.000000e+00 : f32
    %100 = vector.broadcast %cst_39 : f32 to vector<16x128xf32>
    %101 = arith.maximumf %99, %100 : vector<16x128xf32>
    %c0_40 = arith.constant 0 : index
    %c0_41 = arith.constant 0 : index
    %102 = vector.load %arg6[%c0_40, %c0_41] : memref<16x128xf32, #tpu.memory_space<vmem>>, vector<16x128xf32>
    tpu.vector_store %arg6[%c0_40, %c0_41], %101 {strides = array<i32>} : memref<16x128xf32, #tpu.memory_space<vmem>>, vector<16x128xf32>,
    return
  }
  func.func @transform_0(%arg0: i32) -> (i32, i32) {
    %c0_i32 = arith.constant 0 : i32
    %c0_i32_0 = arith.constant 0 : i32
    return %arg0, %c0_i32 : i32, i32
  }
  func.func @transform_1(%arg0: i32) -> (i32, i32) {
    %c0_i32 = arith.constant 0 : i32
    %c0_i32_0 = arith.constant 0 : i32
    %c0_i32_1 = arith.constant 0 : i32
    return %c0_i32, %c0_i32_0 : i32, i32
  }
  func.func @transform_2(%arg0: i32) -> (i32, i32) {
    %c0_i32 = arith.constant 0 : i32
    %c0_i32_0 = arith.constant 0 : i32
    %c0_i32_1 = arith.constant 0 : i32
    return %c0_i32, %c0_i32_0 : i32, i32
  }
  func.func @transform_3(%arg0: i32) -> (i32, i32) {
    %c0_i32 = arith.constant 0 : i32
    %c0_i32_0 = arith.constant 0 : i32
    %c0_i32_1 = arith.constant 0 : i32
    return %c0_i32, %c0_i32_0 : i32, i32
  }
  func.func @transform_4(%arg0: i32) -> (i32, i32) {
    %c0_i32 = arith.constant 0 : i32
    %c0_i32_0 = arith.constant 0 : i32
    %c0_i32_1 = arith.constant 0 : i32
    return %c0_i32, %c0_i32_0 : i32, i32
  }
  func.func @transform_5(%arg0: i32) -> (i32, i32) {
    %c0_i32 = arith.constant 0 : i32
    %c0_i32_0 = arith.constant 0 : i32
    return %arg0, %c0_i32 : i32, i32
  }
}

</mosaic_0001>

<bundles_post_ra>
// kernel: tpu_custom_call.1
= control target key start
LH: loop header
LB: loop body
LE: loop exit
PB: predicated region body
PF: predicated region fallthrough
CT: control target
= control target key end

     0   :  { %10 = vsyncpa [#allocation3], 0  ;;  %s1069_s0 = inlined_call_operand.hbm [shape: bf16[16,128], index: 0, kind: input, shape index: {}]   ;;  %s1070_s1 = inlined_call_operand.hbm [shape: bf16[128,128], index: 1, kind: input, shape index: {}]   ;;  %s1071_s2 = inlined_call_operand.hbm [shape: bf16[128,128], index: 2, kind: input, shape index: {}]   ;;  %s1072_s3 = inlined_call_operand.hbm [shape: bf16[128,128], index: 3, kind: input, shape index: {}]   ;;  %s1073_s4 = inlined_call_operand.hbm [shape: f32[16,128], index: 4, kind: input, shape index: {}]   ;;  %s1074_s5 = inlined_call_operand.hbm [shape: f32[16,128], index: 5, kind: output, shape index: {}]  }
   0x1   :  { %11 = vsyncpa [#allocation6], 0 }
   0x2   :  { %12 = vsyncpa [#allocation9], 0 }
   0x3   :  { %13 = vsyncpa [#allocation4], 0  ;;  %s893_s18 = smov [#allocation5]   ;;  %s894_s20 = smov [#allocation8]  }
   0x4   :  { %s31_s19 = sshll.u32 %s893_s18, 4  ;;  %s55_s21 = sshll.u32 %s894_s20, 4  ;;  %s32_s19 = int_to_ptr.vmem [resolvable:$true] %s31_s19  ;;  %s935_s21 = int_to_ptr.vmem [resolvable:$true] %s55_s21 }
   0x5   :  { %s753_s24 = scalar_lea.hbm %s1070_s1, 1024 }
   0x6   :  { %p754_p0 = scmp.ne.s32.totalorder %s1070_s1, %s753_s24  ;;  %p757_p1 = scmp.lt.u32.totalorder %s753_s24, %s1070_s1 }
   0x8   :  { %p759_p2 = pnand %p757_p1, %p754_p0 }
   0xa   :  { %762 = shalt.err (!%p759_p2)
}
   0xb   :  { %s763_s29 = scalar_lea.vmem %s32_s19, 1024  ;;  %p768_p4 = scmp.lt.s32.totalorder %s32_s19, %s32_s19 }
   0xc   :  { %p764_p3 = scmp.ne.s32.totalorder %s32_s19, %s763_s29  ;;  %p769_p5 = scmp.lt.s32.totalorder %s763_s29, %s763_s29 }
   0xe   :  { %p770_p6 = por %p769_p5, %p768_p4 }
  0x10   :  { %p771_p7 = pnand %p770_p6, %p764_p3 }
  0x12   :  { %774 = shalt.err (!%p771_p7)
}
  0x13   :  { %s895_s30 = smov 64   ;;  %s896_s6 = smov 4  }
  0x14   :  { %37 = dma.hbm_to_vmem [thread:$0]  %s1070_s1, 1024, %s32_s19, [#allocation6], %s895_s30, %s895_s30, %s896_s6  }
  0x15   :  { %s775_s11 = scalar_lea.hbm %s1072_s3, 1024 }
  0x16   :  { %p776_p8 = scmp.ne.s32.totalorder %s1072_s3, %s775_s11  ;;  %p779_p9 = scmp.lt.u32.totalorder %s775_s11, %s1072_s3 }
  0x18   :  { %p781_p10 = pnand %p779_p9, %p776_p8 }
  0x1a   :  { %784 = shalt.err (!%p781_p10)
}
  0x1b   :  { %s785_s16 = scalar_lea.vmem %s935_s21, 1024  ;;  %p790_p12 = scmp.lt.s32.totalorder %s935_s21, %s935_s21 }
  0x1c   :  { %p786_p11 = scmp.ne.s32.totalorder %s935_s21, %s785_s16  ;;  %p791_p13 = scmp.lt.s32.totalorder %s785_s16, %s785_s16 }
  0x1e   :  { %p792_p0 = por %p791_p13, %p790_p12 }
  0x20   :  { %p793_p1 = pnand %p792_p0, %p786_p11 }
  0x22   :  { %796 = shalt.err (!%p793_p1)
}
  0x23   :  { %61 = dma.hbm_to_vmem [thread:$0]  %s1072_s3, 1024, %s935_s21, [#allocation9], %s895_s30, %s895_s30, %s896_s6  }
  0x24   :  { %s897_s18 = smov [#allocation2]   ;;  %s898_s20 = smov [#allocation7]  }
  0x25   :  { %s19_s19 = sshll.u32 %s897_s18, 4  ;;  %s43_s22 = sshll.u32 %s898_s20, 4  ;;  %s20_s19 = int_to_ptr.vmem [resolvable:$true] %s19_s19  ;;  %s972_s22 = int_to_ptr.vmem [resolvable:$true] %s43_s22 }
  0x26   :  { %s797_s25 = scalar_lea.hbm %s1069_s0, 128 }
  0x27   :  { %p798_p2 = scmp.ne.s32.totalorder %s1069_s0, %s797_s25  ;;  %p801_p3 = scmp.lt.u32.totalorder %s797_s25, %s1069_s0 }
  0x29   :  { %p803_p4 = pnand %p801_p3, %p798_p2 }
  0x2b   :  { %806 = shalt.err (!%p803_p4)
}
  0x2c   :  { %s807_s3 = scalar_lea.vmem %s20_s19, 128  ;;  %p812_p6 = scmp.lt.s32.totalorder %s20_s19, %s20_s19 }
  0x2d   :  { %p808_p5 = scmp.ne.s32.totalorder %s20_s19, %s807_s3  ;;  %p813_p7 = scmp.lt.s32.totalorder %s807_s3, %s807_s3 }
  0x2f   :  { %p814_p8 = por %p813_p7, %p812_p6 }
  0x31   :  { %p815_p9 = pnand %p814_p8, %p808_p5 }
  0x33   :  { %818 = shalt.err (!%p815_p9)
}
  0x34   :  { %25 = dma.hbm_to_vmem [thread:$0]  %s1069_s0, 128, %s20_s19, [#allocation3], %s895_s30, %s895_s30, %s896_s6  }
  0x35   :  { %s819_s10 = scalar_lea.hbm %s1071_s2, 1024 }
  0x36   :  { %p820_p10 = scmp.ne.s32.totalorder %s1071_s2, %s819_s10  ;;  %p823_p11 = scmp.lt.u32.totalorder %s819_s10, %s1071_s2 }
  0x38   :  { %p825_p12 = pnand %p823_p11, %p820_p10 }
  0x3a   :  { %828 = shalt.err (!%p825_p12)
}
  0x3b   :  { %s829_s15 = scalar_lea.vmem %s972_s22, 1024  ;;  %p834_p0 = scmp.lt.s32.totalorder %s972_s22, %s972_s22 }
  0x3c   :  { %p830_p13 = scmp.ne.s32.totalorder %s972_s22, %s829_s15  ;;  %p835_p1 = scmp.lt.s32.totalorder %s829_s15, %s829_s15 }
  0x3e   :  { %p836_p2 = por %p835_p1, %p834_p0 }
  0x40   :  { %p837_p3 = pnand %p836_p2, %p830_p13 }
  0x42   :  { %840 = shalt.err (!%p837_p3)
}
  0x43   :  { %49 = dma.hbm_to_vmem [thread:$0]  %s1071_s2, 1024, %s972_s22, [#allocation6], %s895_s30, %s895_s30, %s896_s6  }
  0x44   :  { %s899_s1 = smov [#allocation10]   ;;  %s841_s20 = scalar_lea.hbm %s1073_s4, 256 }
  0x45   :  { %s67_s17 = sshll.u32 %s899_s1, 4  ;;  %p842_p4 = scmp.ne.s32.totalorder %s1073_s4, %s841_s20  ;;  %s68_s17 = int_to_ptr.vmem [resolvable:$true] %s67_s17 }
  0x46   :  { %p845_p5 = scmp.lt.u32.totalorder %s841_s20, %s1073_s4 }
  0x48   :  { %p847_p6 = pnand %p845_p5, %p842_p4 }
  0x4a   :  { %850 = shalt.err (!%p847_p6)
}
  0x4b   :  { %s851_s27 = scalar_lea.vmem %s68_s17, 256  ;;  %p856_p8 = scmp.lt.s32.totalorder %s68_s17, %s68_s17 }
  0x4c   :  { %p852_p7 = scmp.ne.s32.totalorder %s68_s17, %s851_s27  ;;  %p857_p9 = scmp.lt.s32.totalorder %s851_s27, %s851_s27 }
  0x4e   :  { %p858_p10 = por %p857_p9, %p856_p8 }
  0x50   :  { %p859_p11 = pnand %p858_p10, %p852_p7 }
  0x52   :  { %862 = shalt.err (!%p859_p11)
}
  0x53   :  { %s900_s2 = smov 128   ;;  %s901_s30 = smov 8  }
  0x54   :  { %73 = dma.hbm_to_vmem [thread:$0]  %s1073_s4, 256, %s68_s17, [#allocation9], %s900_s2, %s900_s2, %s901_s30  }
  0x55   :  { %885 = dma.done.wait [#allocation3], 128  }
  0x56   :  { %886 = vsyncadd [#allocation3], 4294967168 }
  0x57   :  { %887 = dma.done.wait [#allocation6], 2048  }
  0x58   :  { %888 = vsyncadd [#allocation6], 4294965248 }
  0x59   :  { %889 = dma.done.wait [#allocation9], 1280  }
  0x5a   :  { %890 = vsyncadd [#allocation9], 4294966016  ;;  %v902_v0 = vmov 0.0   ;;  %vm903_vm0 = vmmov 0   ;;  %v716_v1 = vld [vmem:[#allocation5] sm:$0xff]   ;;  %v717_v2 = vld [vmem:[#allocation5 + $0x8] sm:$0xff]  }
  0x5b   :  { %644 = vmatprep.subr.bf16.mxu0 %v902_v0  ;;  %660 = vmatprep.mubr.msk.bf16.mxu0 %vm903_vm0, %v902_v0  ;;  %v718_v3 = vld [vmem:[#allocation5 + $0x10] sm:$0xff]   ;;  %v719_v4 = vld [vmem:[#allocation5 + $0x18] sm:$0xff]   ;;  %v720_v5 = vld [vmem:[#allocation5 + $0x20] sm:$0xff]   ;;  %s904_s4 = smov [#allocation11]  }
  0x5c   :  { %664 = vmatprep.subr.bf16.mxu1 %v902_v0  ;;  %680 = vmatprep.mubr.msk.bf16.mxu1 %vm903_vm0, %v902_v0  ;;  %v721_v6 = vld [vmem:[#allocation5 + $0x28] sm:$0xff]   ;;  %v722_v7 = vld [vmem:[#allocation5 + $0x30] sm:$0xff]   ;;  %v723_v8 = vld [vmem:[#allocation5 + $0x38] sm:$0xff]   ;;  %s569_s28 = sshll.u32 %s904_s4, 4  ;;  %s570_s28 = int_to_ptr.vmem [resolvable:$true] %s569_s28 }
  0x5d   :  { %645 = vmatpush3.bf16.msra.mxu0 %v716_v1  ;;  %v724_v9 = vld [vmem:[#allocation2] sm:$0xff]   ;;  %v583_v10 = vld [vmem:[#allocation10] ss:$0 sm:$0xff]  ;;  %v726_v20 = vld [vmem:[#allocation7 + $0x8] sm:$0xff]   ;;  %s863_s29 = scalar_lea.vmem %s570_s28, 256  ;;  %p868_p13 = scmp.lt.s32.totalorder %s570_s28, %s570_s28 }
  0x5e   :  { %646 = vmatprep.subr.bf16.mxu0 %v902_v0  ;;  %v725_v19 = vld [vmem:[#allocation7] sm:$0xff]   ;;  %v727_v21 = vld [vmem:[#allocation7 + $0x10] sm:$0xff]   ;;  %v728_v22 = vld [vmem:[#allocation7 + $0x18] sm:$0xff]   ;;  %p864_p12 = scmp.ne.s32.totalorder %s570_s28, %s863_s29  ;;  %p869_p0 = scmp.lt.s32.totalorder %s863_s29, %s863_s29 }
  0x5f   :  { %665 = vmatpush3.bf16.msra.mxu1 %v725_v19  ;;  %v729_v23 = vld [vmem:[#allocation7 + $0x20] sm:$0xff]   ;;  %v730_v24 = vld [vmem:[#allocation7 + $0x28] sm:$0xff]   ;;  %v731_v25 = vld [vmem:[#allocation7 + $0x30] sm:$0xff]  }
  0x60   :  { %666 = vmatprep.subr.bf16.mxu1 %v902_v0  ;;  %v732_v26 = vld [vmem:[#allocation7 + $0x38] sm:$0xff]   ;;  %v593_v45 = vld [vmem:[#allocation10 + $0x1] ss:$0 sm:$0xff]  ;;  %v594_v50 = vld [vmem:[#allocation10 + $0x2] ss:$0 sm:$0xff]  ;;  %p870_p1 = por %p869_p0, %p868_p13 }
  0x61   :  { %647 = vmatpush3.bf16.msra.mxu0 %v717_v2  ;;  %v595_v58 = vld [vmem:[#allocation10 + $0x3] ss:$0 sm:$0xff] }
  0x62   :  { %648 = vmatprep.subr.bf16.mxu0 %v902_v0  ;;  %p871_p2 = pnand %p870_p1, %p864_p12 }
  0x63   :  { %667 = vmatpush3.bf16.msra.mxu1 %v726_v20 }
  0x64   :  { %668 = vmatprep.subr.bf16.mxu1 %v902_v0 }
  0x65   :  { %649 = vmatpush3.bf16.msra.mxu0 %v718_v3 }
  0x66   :  { %650 = vmatprep.subr.bf16.mxu0 %v902_v0 }
  0x67   :  { %669 = vmatpush3.bf16.msra.mxu1 %v727_v21 }
  0x68   :  { %670 = vmatprep.subr.bf16.mxu1 %v902_v0 }
  0x69   :  { %651 = vmatpush3.bf16.msra.mxu0 %v719_v4  ;;  %v733_v4 = vld [vmem:[#allocation8] sm:$0xff]  }
  0x6a   :  { %652 = vmatprep.subr.bf16.mxu0 %v902_v0 }
  0x6b   :  { %671 = vmatpush3.bf16.msra.mxu1 %v728_v22 }
  0x6c   :  { %672 = vmatprep.subr.bf16.mxu1 %v902_v0 }
  0x6d   :  { %653 = vmatpush3.bf16.msra.mxu0 %v720_v5  ;;  %v734_v5 = vld [vmem:[#allocation8 + $0x8] sm:$0xff]  }
  0x6e   :  { %654 = vmatprep.subr.bf16.mxu0 %v902_v0 }
  0x6f   :  { %673 = vmatpush3.bf16.msra.mxu1 %v729_v23 }
  0x70   :  { %674 = vmatprep.subr.bf16.mxu1 %v902_v0 }
  0x71   :  { %655 = vmatpush3.bf16.msra.mxu0 %v721_v6  ;;  %v735_v6 = vld [vmem:[#allocation8 + $0x10] sm:$0xff]  }
  0x72   :  { %656 = vmatprep.subr.bf16.mxu0 %v902_v0 }
  0x73   :  { %675 = vmatpush3.bf16.msra.mxu1 %v730_v24 }
  0x74   :  { %676 = vmatprep.subr.bf16.mxu1 %v902_v0 }
  0x75   :  { %657 = vmatpush3.bf16.msra.mxu0 %v722_v7  ;;  %v736_v7 = vld [vmem:[#allocation8 + $0x18] sm:$0xff]  }
  0x76   :  { %658 = vmatprep.subr.bf16.mxu0 %v902_v0 }
  0x77   :  { %677 = vmatpush3.bf16.msra.mxu1 %v731_v25 }
  0x78   :  { %678 = vmatprep.subr.bf16.mxu1 %v902_v0 }
  0x79   :  { %659 = vmatpush3.bf16.msra.mxu0 %v723_v8  ;;  %v737_v8 = vld [vmem:[#allocation8 + $0x20] sm:$0xff]  }
  0x7a   :  { %684 = vmatprep.subr.bf16.mxu0 %v902_v0 }
  0x7b   :  { %679 = vmatpush3.bf16.msra.mxu1 %v732_v26 }
  0x7c   :  { %661 = vmatmul.mubr.bf16.vlgmr.msra.gmra.mrb[0].mxu0 %v724_v9  ;;  %v738_v9 = vld [vmem:[#allocation8 + $0x28] sm:$0xff]  }
  0x7d   :  { %700 = vmatprep.mubr.msk.bf16.mxu0 %vm903_vm0, %v902_v0  ;;  %685 = vmatpush3.bf16.msra.mxu0 %v733_v4 }
  0x7e   :  { %686 = vmatprep.subr.bf16.mxu0 %v902_v0 }
  0x81   :  { %687 = vmatpush3.bf16.msra.mxu0 %v734_v5 }
  0x82   :  { %688 = vmatprep.subr.bf16.mxu0 %v902_v0 }
  0x85   :  { %689 = vmatpush3.bf16.msra.mxu0 %v735_v6  ;;  %v615_v6 = vld [vmem:[#allocation10 + $0x7] ss:$0 sm:$0xff] }
  0x86   :  { %690 = vmatprep.subr.bf16.mxu0 %v902_v0 }
  0x89   :  { %691 = vmatpush3.bf16.msra.mxu0 %v736_v7 }
  0x8a   :  { %692 = vmatprep.subr.bf16.mxu0 %v902_v0 }
  0x8d   :  { %693 = vmatpush3.bf16.msra.mxu0 %v737_v8 }
  0x8e   :  { %694 = vmatprep.subr.bf16.mxu0 %v902_v0 }
  0x91   :  { %695 = vmatpush3.bf16.msra.mxu0 %v738_v9 }
  0x92   :  { %696 = vmatprep.subr.bf16.mxu0 %v902_v0 }
 0x14f   :  { %v201_v11 = vpop.f32.mrb[0].mxu0 }
 0x150   :  { %v202_v12 = vadd.f32 %v583_v10, %v201_v11  ;;  %v662_v13 = vpop.f32.mrb[1].mxu0  ;;  %v740_v11 = vld [vmem:[#allocation8 + $0x38] sm:$0xff]  }
 0x151   :  { %v204_v14 = vpop.f32.mrb[2].mxu0 }
 0x152   :  { %v205_v15 = vadd.f32 %v583_v10, %v204_v14  ;;  %208 = vadd.xlane.f32.xlu0 %v202_v12  ;;  %v663_v16 = vpop.f32.mrb[3].mxu0  ;;  %v212_v17 = vmul.f32 %v202_v12, %v202_v12  ;;  %v739_v10 = vld [vmem:[#allocation8 + $0x30] sm:$0xff]  }
 0x153   :  { %697 = vmatpush3.bf16.msra.mxu0 %v739_v10  ;;  %v616_v10 = vld [vmem:[#allocation10 + $0x8] ss:$0 sm:$0xff] }
 0x154   :  { %214 = vadd.xlane.f32.xlu1 %v212_v17  ;;  %v213_v18 = vmul.f32 %v205_v15, %v205_v15  ;;  %698 = vmatprep.subr.bf16.mxu0 %v902_v0 }
 0x156   :  { %210 = vadd.xlane.f32.xlu0 %v205_v15 }
 0x157   :  { %699 = vmatpush3.bf16.msra.mxu0 %v740_v11 }
 0x158   :  { %216 = vadd.xlane.f32.xlu1 %v213_v18 }
 0x1df   :  { %v209_v27 = vpop.xlane.xlu0 %208 }
 0x1e0   :  { %v218_v28 = vmul.f32 0.03125, %v209_v27 }
 0x1e1   :  { %v215_v29 = vpop.xlane.xlu1 %214 }
 0x1e2   :  { %v222_v30 = vmul.f32 %v218_v28, %v218_v28  ;;  %v220_v31 = vmul.f32 0.03125, %v215_v29  ;;  %v228_v43 = vsub.f32 %v202_v12, %v218_v28  ;;  %v604_v29 = vld [vmem:[#allocation10 + $0x4] ss:$0 sm:$0xff] }
 0x1e3   :  { %v211_v32 = vpop.xlane.xlu0 %210 }
 0x1e4   :  { %v224_v33 = vsub.f32 %v220_v31, %v222_v30  ;;  %v219_v34 = vmul.f32 0.03125, %v211_v32 }
 0x1e5   :  { %v217_v35 = vpop.xlane.xlu1 %216 }
 0x1e6   :  { %v226_v36 = vmax.f32 %v224_v33, 0.0  ;;  %v223_v37 = vmul.f32 %v219_v34, %v219_v34  ;;  %v221_v38 = vmul.f32 0.03125, %v217_v35  ;;  %v229_v47 = vsub.f32 %v205_v15, %v219_v34  ;;  %v605_v33 = vld [vmem:[#allocation10 + $0x5] ss:$0 sm:$0xff] }
 0x1e8   :  { %v230_v39 = vadd.f32 1e-05, %v226_v36  ;;  %v225_v40 = vsub.f32 %v221_v38, %v223_v37 }
 0x1ea   :  { %741 = vrsqrt.f32 %v230_v39  ;;  %v227_v41 = vmax.f32 %v225_v40, 0.0 }
 0x1ec   :  { %v231_v42 = vadd.f32 1e-05, %v227_v41 }
 0x1ee   :  { %743 = vrsqrt.f32 %v231_v42  ;;  %v606_v42 = vld [vmem:[#allocation10 + $0x6] ss:$0 sm:$0xff] }
 0x1f4   :  { %v742_v44 = vpop.eup %741 }
 0x1f5   :  { %v234_v46 = vmul.f32 %v742_v44, %v228_v43 }
 0x1f7   :  { %v241_v48 = vmul.f32 %v593_v45, %v234_v46 }
 0x1f8   :  { %v744_v49 = vpop.eup %743 }
 0x1f9   :  { %v235_v51 = vmul.f32 %v744_v49, %v229_v47  ;;  %v248_v53 = vadd.f32 %v594_v50, %v241_v48 }
 0x1fb   :  { %v242_v52 = vmul.f32 %v593_v45, %v235_v51  ;;  %v250_v55 = vmax.f32 %v248_v53, 0.0 }
 0x1fd   :  { %v249_v54 = vadd.f32 %v594_v50, %v242_v52 }
 0x1ff   :  { %v251_v56 = vmax.f32 %v249_v54, 0.0 }
 0x201   :  { %v252_v57 = vpack.c.bf16 %v251_v56, %v250_v55 }
 0x203   :  { %681 = vmatmul.mubr.bf16.vlgmr.msra.gmra.mrb[0].mxu1 %v252_v57 }
 0x2d6   :  { %v356_v59 = vpop.f32.mrb[0].mxu1 }
 0x2d7   :  { %v357_v60 = vadd.f32 %v595_v58, %v356_v59  ;;  %v682_v61 = vpop.f32.mrb[1].mxu1 }
 0x2d8   :  { %v359_v62 = vpop.f32.mrb[2].mxu1 }
 0x2d9   :  { %v360_v63 = vadd.f32 %v595_v58, %v359_v62  ;;  %363 = vadd.xlane.f32.xlu0 %v357_v60  ;;  %v683_v1 = vpop.f32.mrb[3].mxu1  ;;  %v367_v2 = vmul.f32 %v357_v60, %v357_v60 }
 0x2db   :  { %365 = vadd.xlane.f32.xlu1 %v360_v63  ;;  %v368_v3 = vmul.f32 %v360_v63, %v360_v63 }
 0x2dd   :  { %369 = vadd.xlane.f32.xlu0 %v367_v2 }
 0x2df   :  { %371 = vadd.xlane.f32.xlu1 %v368_v3 }
 0x366   :  { %v364_v12 = vpop.xlane.xlu0 %363 }
 0x367   :  { %v373_v13 = vmul.f32 0.03125, %v364_v12 }
 0x368   :  { %v366_v14 = vpop.xlane.xlu1 %365 }
 0x369   :  { %v374_v15 = vmul.f32 0.03125, %v366_v14  ;;  %v377_v17 = vmul.f32 %v373_v13, %v373_v13  ;;  %v383_v0 = vsub.f32 %v357_v60, %v373_v13 }
 0x36a   :  { %v370_v16 = vpop.xlane.xlu0 %369 }
 0x36b   :  { %v375_v18 = vmul.f32 0.03125, %v370_v16  ;;  %v378_v20 = vmul.f32 %v374_v15, %v374_v15  ;;  %v384_v30 = vsub.f32 %v360_v63, %v374_v15 }
 0x36c   :  { %v372_v19 = vpop.xlane.xlu1 %371 }
 0x36d   :  { %v379_v21 = vsub.f32 %v375_v18, %v377_v17  ;;  %v376_v22 = vmul.f32 0.03125, %v372_v19 }
 0x36f   :  { %v381_v23 = vmax.f32 %v379_v21, 0.0  ;;  %v380_v24 = vsub.f32 %v376_v22, %v378_v20 }
 0x371   :  { %v385_v25 = vadd.f32 1e-05, %v381_v23  ;;  %v382_v26 = vmax.f32 %v380_v24, 0.0 }
 0x373   :  { %745 = vrsqrt.f32 %v385_v25  ;;  %v386_v27 = vadd.f32 1e-05, %v382_v26 }
 0x375   :  { %747 = vrsqrt.f32 %v386_v27 }
 0x37d   :  { %v746_v28 = vpop.eup %745 }
 0x37e   :  { %v389_v31 = vmul.f32 %v746_v28, %v383_v0 }
 0x37f   :  { %v748_v32 = vpop.eup %747 }
 0x380   :  { %v390_v34 = vmul.f32 %v748_v32, %v384_v30  ;;  %v396_v35 = vmul.f32 %v604_v29, %v389_v31 }
 0x382   :  { %v397_v36 = vmul.f32 %v604_v29, %v390_v34  ;;  %v403_v37 = vadd.f32 %v605_v33, %v396_v35 }
 0x384   :  { %v404_v38 = vadd.f32 %v605_v33, %v397_v36  ;;  %v405_v39 = vmax.f32 %v403_v37, 0.0 }
 0x386   :  { %v406_v40 = vmax.f32 %v404_v38, 0.0 }
 0x388   :  { %v407_v41 = vpack.c.bf16 %v406_v40, %v405_v39 }
 0x38a   :  { %701 = vmatmul.mubr.bf16.vlgmr.msra.gmra.mrb[4].mxu0 %v407_v41 }
 0x45d   :  { %v511_v43 = vpop.f32.mrb[4].mxu0 }
 0x45e   :  { %v512_v44 = vadd.f32 %v606_v42, %v511_v43  ;;  %v702_v45 = vpop.f32.mrb[5].mxu0 }
 0x45f   :  { %v514_v46 = vpop.f32.mrb[6].mxu0 }
 0x460   :  { %v515_v47 = vadd.f32 %v606_v42, %v514_v46  ;;  %518 = vadd.xlane.f32.xlu0 %v512_v44  ;;  %v703_v48 = vpop.f32.mrb[7].mxu0  ;;  %v522_v49 = vmul.f32 %v512_v44, %v512_v44 }
 0x462   :  { %520 = vadd.xlane.f32.xlu1 %v515_v47  ;;  %v523_v50 = vmul.f32 %v515_v47, %v515_v47 }
 0x464   :  { %524 = vadd.xlane.f32.xlu0 %v522_v49 }
 0x466   :  { %526 = vadd.xlane.f32.xlu1 %v523_v50 }
 0x4ed   :  { %v519_v51 = vpop.xlane.xlu0 %518 }
 0x4ee   :  { %v528_v52 = vmul.f32 0.03125, %v519_v51 }
 0x4ef   :  { %v521_v53 = vpop.xlane.xlu1 %520 }
 0x4f0   :  { %v529_v54 = vmul.f32 0.03125, %v521_v53  ;;  %v532_v56 = vmul.f32 %v528_v52, %v528_v52  ;;  %v538_v4 = vsub.f32 %v512_v44, %v528_v52 }
 0x4f1   :  { %v525_v55 = vpop.xlane.xlu0 %524 }
 0x4f2   :  { %v530_v57 = vmul.f32 0.03125, %v525_v55  ;;  %v533_v59 = vmul.f32 %v529_v54, %v529_v54  ;;  %v539_v7 = vsub.f32 %v515_v47, %v529_v54 }
 0x4f3   :  { %v527_v58 = vpop.xlane.xlu1 %526 }
 0x4f4   :  { %v534_v60 = vsub.f32 %v530_v57, %v532_v56  ;;  %v531_v61 = vmul.f32 0.03125, %v527_v58 }
 0x4f6   :  { %v536_v62 = vmax.f32 %v534_v60, 0.0  ;;  %v535_v63 = vsub.f32 %v531_v61, %v533_v59 }
 0x4f8   :  { %v540_v1 = vadd.f32 1e-05, %v536_v62  ;;  %v537_v2 = vmax.f32 %v535_v63, 0.0 }
 0x4fa   :  { %749 = vrsqrt.f32 %v540_v1  ;;  %v541_v3 = vadd.f32 1e-05, %v537_v2 }
 0x4fc   :  { %751 = vrsqrt.f32 %v541_v3 }
 0x504   :  { %v750_v5 = vpop.eup %749 }
 0x505   :  { %v544_v8 = vmul.f32 %v750_v5, %v538_v4 }
 0x506   :  { %v752_v9 = vpop.eup %751 }
 0x507   :  { %v545_v11 = vmul.f32 %v752_v9, %v539_v7  ;;  %v551_v12 = vmul.f32 %v615_v6, %v544_v8 }
 0x509   :  { %v552_v13 = vmul.f32 %v615_v6, %v545_v11  ;;  %v558_v14 = vadd.f32 %v616_v10, %v551_v12 }
 0x50b   :  { %v559_v15 = vadd.f32 %v616_v10, %v552_v13  ;;  %v560_v16 = vmax.f32 %v558_v14, 0.0 }
 0x50d   :  { %v561_v17 = vmax.f32 %v559_v15, 0.0  ;;  %562 = vst [vmem:[#allocation11] sm:$0xff] %v560_v16 }
 0x50f   :  { %563 = vst [vmem:[#allocation11 + $0x8] sm:$0xff] %v561_v17 }
 0x510   :  { %874 = shalt.err (!%p871_p2)
}
 0x511   :  { %s875_s7 = scalar_lea.hbm %s1074_s5, 256 }
 0x512   :  { %p876_p3 = scmp.ne.s32.totalorder %s1074_s5, %s875_s7  ;;  %p879_p4 = scmp.lt.u32.totalorder %s875_s7, %s1074_s5 }
 0x514   :  { %p881_p5 = pnand %p879_p4, %p876_p3 }
 0x516   :  { %884 = shalt.err (!%p881_p5)
}
 0x517   :  { %575 = dma.vmem_to_hbm [thread:$0]  %s570_s28, 256, %s1074_s5, [#allocation4], %s900_s2, %s900_s2, %s901_s30  }
 0x518   :  { %891 = dma.done.wait [#allocation4], 256  }
 0x519   :  { %892 = vsyncadd [#allocation4], 4294967040 }
 0x51a   :  { %579 = vsyncpa [#allocation3], 1 }
 0x51b   :  { %580 = vsyncpa [#allocation6], 1 }
 0x51c   :  { %581 = vsyncpa [#allocation9], 1 }
 0x51d   :  { %582 = vsyncpa [#allocation4], 1 }

// kernel: tpu_custom_call.1
= control target key start
LH: loop header
LB: loop body
LE: loop exit
PB: predicated region body
PF: predicated region fallthrough
CT: control target
= control target key end

     0   :  { %10 = vsyncpa [#allocation3], 0  ;;  %s1069_s0 = inlined_call_operand.hbm [shape: bf16[16,128], index: 0, kind: input, shape index: {}]   ;;  %s1070_s1 = inlined_call_operand.hbm [shape: bf16[128,128], index: 1, kind: input, shape index: {}]   ;;  %s1071_s2 = inlined_call_operand.hbm [shape: bf16[128,128], index: 2, kind: input, shape index: {}]   ;;  %s1072_s3 = inlined_call_operand.hbm [shape: bf16[128,128], index: 3, kind: input, shape index: {}]   ;;  %s1073_s4 = inlined_call_operand.hbm [shape: f32[16,128], index: 4, kind: input, shape index: {}]   ;;  %s1074_s5 = inlined_call_operand.hbm [shape: f32[16,128], index: 5, kind: output, shape index: {}]  }
   0x1   :  { %11 = vsyncpa [#allocation6], 0 }
   0x2   :  { %12 = vsyncpa [#allocation9], 0 }
   0x3   :  { %13 = vsyncpa [#allocation4], 0  ;;  %s893_s18 = smov [#allocation5]   ;;  %s894_s20 = smov [#allocation8]  }
   0x4   :  { %s31_s19 = sshll.u32 %s893_s18, 4  ;;  %s55_s21 = sshll.u32 %s894_s20, 4  ;;  %s32_s19 = int_to_ptr.vmem [resolvable:$true] %s31_s19  ;;  %s935_s21 = int_to_ptr.vmem [resolvable:$true] %s55_s21 }
   0x5   :  { %s753_s24 = scalar_lea.hbm %s1070_s1, 1024 }
   0x6   :  { %p754_p0 = scmp.ne.s32.totalorder %s1070_s1, %s753_s24  ;;  %p757_p1 = scmp.lt.u32.totalorder %s753_s24, %s1070_s1 }
   0x8   :  { %p759_p2 = pnand %p757_p1, %p754_p0 }
   0xa   :  { %762 = shalt.err (!%p759_p2)
}
   0xb   :  { %s763_s29 = scalar_lea.vmem %s32_s19, 1024  ;;  %p768_p4 = scmp.lt.s32.totalorder %s32_s19, %s32_s19 }
   0xc   :  { %p764_p3 = scmp.ne.s32.totalorder %s32_s19, %s763_s29  ;;  %p769_p5 = scmp.lt.s32.totalorder %s763_s29, %s763_s29 }
   0xe   :  { %p770_p6 = por %p769_p5, %p768_p4 }
  0x10   :  { %p771_p7 = pnand %p770_p6, %p764_p3 }
  0x12   :  { %774 = shalt.err (!%p771_p7)
}
  0x13   :  { %s895_s30 = smov 64   ;;  %s896_s6 = smov 4  }
  0x14   :  { %37 = dma.hbm_to_vmem [thread:$0]  %s1070_s1, 1024, %s32_s19, [#allocation6], %s895_s30, %s895_s30, %s896_s6  }
  0x15   :  { %s775_s11 = scalar_lea.hbm %s1072_s3, 1024 }
  0x16   :  { %p776_p8 = scmp.ne.s32.totalorder %s1072_s3, %s775_s11  ;;  %p779_p9 = scmp.lt.u32.totalorder %s775_s11, %s1072_s3 }
  0x18   :  { %p781_p10 = pnand %p779_p9, %p776_p8 }
  0x1a   :  { %784 = shalt.err (!%p781_p10)
}
  0x1b   :  { %s785_s16 = scalar_lea.vmem %s935_s21, 1024  ;;  %p790_p12 = scmp.lt.s32.totalorder %s935_s21, %s935_s21 }
  0x1c   :  { %p786_p11 = scmp.ne.s32.totalorder %s935_s21, %s785_s16  ;;  %p791_p13 = scmp.lt.s32.totalorder %s785_s16, %s785_s16 }
  0x1e   :  { %p792_p0 = por %p791_p13, %p790_p12 }
  0x20   :  { %p793_p1 = pnand %p792_p0, %p786_p11 }
  0x22   :  { %796 = shalt.err (!%p793_p1)
}
  0x23   :  { %61 = dma.hbm_to_vmem [thread:$0]  %s1072_s3, 1024, %s935_s21, [#allocation9], %s895_s30, %s895_s30, %s896_s6  }
  0x24   :  { %s897_s18 = smov [#allocation2]   ;;  %s898_s20 = smov [#allocation7]  }
  0x25   :  { %s19_s19 = sshll.u32 %s897_s18, 4  ;;  %s43_s22 = sshll.u32 %s898_s20, 4  ;;  %s20_s19 = int_to_ptr.vmem [resolvable:$true] %s19_s19  ;;  %s972_s22 = int_to_ptr.vmem [resolvable:$true] %s43_s22 }
  0x26   :  { %s797_s25 = scalar_lea.hbm %s1069_s0, 128 }
  0x27   :  { %p798_p2 = scmp.ne.s32.totalorder %s1069_s0, %s797_s25  ;;  %p801_p3 = scmp.lt.u32.totalorder %s797_s25, %s1069_s0 }
  0x29   :  { %p803_p4 = pnand %p801_p3, %p798_p2 }
  0x2b   :  { %806 = shalt.err (!%p803_p4)
}
  0x2c   :  { %s807_s3 = scalar_lea.vmem %s20_s19, 128  ;;  %p812_p6 = scmp.lt.s32.totalorder %s20_s19, %s20_s19 }
  0x2d   :  { %p808_p5 = scmp.ne.s32.totalorder %s20_s19, %s807_s3  ;;  %p813_p7 = scmp.lt.s32.totalorder %s807_s3, %s807_s3 }
  0x2f   :  { %p814_p8 = por %p813_p7, %p812_p6 }
  0x31   :  { %p815_p9 = pnand %p814_p8, %p808_p5 }
  0x33   :  { %818 = shalt.err (!%p815_p9)
}
  0x34   :  { %25 = dma.hbm_to_vmem [thread:$0]  %s1069_s0, 128, %s20_s19, [#allocation3], %s895_s30, %s895_s30, %s896_s6  }
  0x35   :  { %s819_s10 = scalar_lea.hbm %s1071_s2, 1024 }
  0x36   :  { %p820_p10 = scmp.ne.s32.totalorder %s1071_s2, %s819_s10  ;;  %p823_p11 = scmp.lt.u32.totalorder %s819_s10, %s1071_s2 }
  0x38   :  { %p825_p12 = pnand %p823_p11, %p820_p10 }
  0x3a   :  { %828 = shalt.err (!%p825_p12)
}
  0x3b   :  { %s829_s15 = scalar_lea.vmem %s972_s22, 1024  ;;  %p834_p0 = scmp.lt.s32.totalorder %s972_s22, %s972_s22 }
  0x3c   :  { %p830_p13 = scmp.ne.s32.totalorder %s972_s22, %s829_s15  ;;  %p835_p1 = scmp.lt.s32.totalorder %s829_s15, %s829_s15 }
  0x3e   :  { %p836_p2 = por %p835_p1, %p834_p0 }
  0x40   :  { %p837_p3 = pnand %p836_p2, %p830_p13 }
  0x42   :  { %840 = shalt.err (!%p837_p3)
}
  0x43   :  { %49 = dma.hbm_to_vmem [thread:$0]  %s1071_s2, 1024, %s972_s22, [#allocation6], %s895_s30, %s895_s30, %s896_s6  }
  0x44   :  { %s899_s1 = smov [#allocation10]   ;;  %s841_s20 = scalar_lea.hbm %s1073_s4, 256 }
  0x45   :  { %s67_s17 = sshll.u32 %s899_s1, 4  ;;  %p842_p4 = scmp.ne.s32.totalorder %s1073_s4, %s841_s20  ;;  %s68_s17 = int_to_ptr.vmem [resolvable:$true] %s67_s17 }
  0x46   :  { %p845_p5 = scmp.lt.u32.totalorder %s841_s20, %s1073_s4 }
  0x48   :  { %p847_p6 = pnand %p845_p5, %p842_p4 }
  0x4a   :  { %850 = shalt.err (!%p847_p6)
}
  0x4b   :  { %s851_s27 = scalar_lea.vmem %s68_s17, 256  ;;  %p856_p8 = scmp.lt.s32.totalorder %s68_s17, %s68_s17 }
  0x4c   :  { %p852_p7 = scmp.ne.s32.totalorder %s68_s17, %s851_s27  ;;  %p857_p9 = scmp.lt.s32.totalorder %s851_s27, %s851_s27 }
  0x4e   :  { %p858_p10 = por %p857_p9, %p856_p8 }
  0x50   :  { %p859_p11 = pnand %p858_p10, %p852_p7 }
  0x52   :  { %862 = shalt.err (!%p859_p11)
}
  0x53   :  { %s900_s2 = smov 128   ;;  %s901_s30 = smov 8  }
  0x54   :  { %73 = dma.hbm_to_vmem [thread:$0]  %s1073_s4, 256, %s68_s17, [#allocation9], %s900_s2, %s900_s2, %s901_s30  }
  0x55   :  { %885 = dma.done.wait [#allocation3], 128  }
  0x56   :  { %886 = vsyncadd [#allocation3], 4294967168 }
  0x57   :  { %887 = dma.done.wait [#allocation6], 2048  }
  0x58   :  { %888 = vsyncadd [#allocation6], 4294965248 }
  0x59   :  { %889 = dma.done.wait [#allocation9], 1280  }
  0x5a   :  { %890 = vsyncadd [#allocation9], 4294966016  ;;  %v902_v0 = vmov 0.0   ;;  %vm903_vm0 = vmmov 0   ;;  %v716_v1 = vld [vmem:[#allocation5] sm:$0xff]   ;;  %v717_v2 = vld [vmem:[#allocation5 + $0x8] sm:$0xff]  }
  0x5b   :  { %644 = vmatprep.subr.bf16.mxu0 %v902_v0  ;;  %660 = vmatprep.mubr.msk.bf16.mxu0 %vm903_vm0, %v902_v0  ;;  %v718_v3 = vld [vmem:[#allocation5 + $0x10] sm:$0xff]   ;;  %v719_v4 = vld [vmem:[#allocation5 + $0x18] sm:$0xff]   ;;  %v720_v5 = vld [vmem:[#allocation5 + $0x20] sm:$0xff]   ;;  %s904_s4 = smov [#allocation11]  }
  0x5c   :  { %664 = vmatprep.subr.bf16.mxu1 %v902_v0  ;;  %680 = vmatprep.mubr.msk.bf16.mxu1 %vm903_vm0, %v902_v0  ;;  %v721_v6 = vld [vmem:[#allocation5 + $0x28] sm:$0xff]   ;;  %v722_v7 = vld [vmem:[#allocation5 + $0x30] sm:$0xff]   ;;  %v723_v8 = vld [vmem:[#allocation5 + $0x38] sm:$0xff]   ;;  %s569_s28 = sshll.u32 %s904_s4, 4  ;;  %s570_s28 = int_to_ptr.vmem [resolvable:$true] %s569_s28 }
  0x5d   :  { %645 = vmatpush3.bf16.msra.mxu0 %v716_v1  ;;  %v724_v9 = vld [vmem:[#allocation2] sm:$0xff]   ;;  %v583_v10 = vld [vmem:[#allocation10] ss:$0 sm:$0xff]  ;;  %v726_v20 = vld [vmem:[#allocation7 + $0x8] sm:$0xff]   ;;  %s863_s29 = scalar_lea.vmem %s570_s28, 256  ;;  %p868_p13 = scmp.lt.s32.totalorder %s570_s28, %s570_s28 }
  0x5e   :  { %646 = vmatprep.subr.bf16.mxu0 %v902_v0  ;;  %v725_v19 = vld [vmem:[#allocation7] sm:$0xff]   ;;  %v727_v21 = vld [vmem:[#allocation7 + $0x10] sm:$0xff]   ;;  %v728_v22 = vld [vmem:[#allocation7 + $0x18] sm:$0xff]   ;;  %p864_p12 = scmp.ne.s32.totalorder %s570_s28, %s863_s29  ;;  %p869_p0 = scmp.lt.s32.totalorder %s863_s29, %s863_s29 }
  0x5f   :  { %665 = vmatpush3.bf16.msra.mxu1 %v725_v19  ;;  %v729_v23 = vld [vmem:[#allocation7 + $0x20] sm:$0xff]   ;;  %v730_v24 = vld [vmem:[#allocation7 + $0x28] sm:$0xff]   ;;  %v731_v25 = vld [vmem:[#allocation7 + $0x30] sm:$0xff]  }
  0x60   :  { %666 = vmatprep.subr.bf16.mxu1 %v902_v0  ;;  %v732_v26 = vld [vmem:[#allocation7 + $0x38] sm:$0xff]   ;;  %v593_v45 = vld [vmem:[#allocation10 + $0x1] ss:$0 sm:$0xff]  ;;  %v594_v50 = vld [vmem:[#allocation10 + $0x2] ss:$0 sm:$0xff]  ;;  %p870_p1 = por %p869_p0, %p868_p13 }
  0x61   :  { %647 = vmatpush3.bf16.msra.mxu0 %v717_v2  ;;  %v595_v58 = vld [vmem:[#allocation10 + $0x3] ss:$0 sm:$0xff] }
  0x62   :  { %648 = vmatprep.subr.bf16.mxu0 %v902_v0  ;;  %p871_p2 = pnand %p870_p1, %p864_p12 }
  0x63   :  { %667 = vmatpush3.bf16.msra.mxu1 %v726_v20 }
  0x64   :  { %668 = vmatprep.subr.bf16.mxu1 %v902_v0 }
  0x65   :  { %649 = vmatpush3.bf16.msra.mxu0 %v718_v3 }
  0x66   :  { %650 = vmatprep.subr.bf16.mxu0 %v902_v0 }
  0x67   :  { %669 = vmatpush3.bf16.msra.mxu1 %v727_v21 }
  0x68   :  { %670 = vmatprep.subr.bf16.mxu1 %v902_v0 }
  0x69   :  { %651 = vmatpush3.bf16.msra.mxu0 %v719_v4  ;;  %v733_v4 = vld [vmem:[#allocation8] sm:$0xff]  }
  0x6a   :  { %652 = vmatprep.subr.bf16.mxu0 %v902_v0 }
  0x6b   :  { %671 = vmatpush3.bf16.msra.mxu1 %v728_v22 }
  0x6c   :  { %672 = vmatprep.subr.bf16.mxu1 %v902_v0 }
  0x6d   :  { %653 = vmatpush3.bf16.msra.mxu0 %v720_v5  ;;  %v734_v5 = vld [vmem:[#allocation8 + $0x8] sm:$0xff]  }
  0x6e   :  { %654 = vmatprep.subr.bf16.mxu0 %v902_v0 }
  0x6f   :  { %673 = vmatpush3.bf16.msra.mxu1 %v729_v23 }
  0x70   :  { %674 = vmatprep.subr.bf16.mxu1 %v902_v0 }
  0x71   :  { %655 = vmatpush3.bf16.msra.mxu0 %v721_v6  ;;  %v735_v6 = vld [vmem:[#allocation8 + $0x10] sm:$0xff]  }
  0x72   :  { %656 = vmatprep.subr.bf16.mxu0 %v902_v0 }
  0x73   :  { %675 = vmatpush3.bf16.msra.mxu1 %v730_v24 }
  0x74   :  { %676 = vmatprep.subr.bf16.mxu1 %v902_v0 }
  0x75   :  { %657 = vmatpush3.bf16.msra.mxu0 %v722_v7  ;;  %v736_v7 = vld [vmem:[#allocation8 + $0x18] sm:$0xff]  }
  0x76   :  { %658 = vmatprep.subr.bf16.mxu0 %v902_v0 }
  0x77   :  { %677 = vmatpush3.bf16.msra.mxu1 %v731_v25 }
  0x78   :  { %678 = vmatprep.subr.bf16.mxu1 %v902_v0 }
  0x79   :  { %659 = vmatpush3.bf16.msra.mxu0 %v723_v8  ;;  %v737_v8 = vld [vmem:[#allocation8 + $0x20] sm:$0xff]  }
  0x7a   :  { %684 = vmatprep.subr.bf16.mxu0 %v902_v0 }
  0x7b   :  { %679 = vmatpush3.bf16.msra.mxu1 %v732_v26 }
  0x7c   :  { %661 = vmatmul.mubr.bf16.vlgmr.msra.gmra.mrb[0].mxu0 %v724_v9  ;;  %v738_v9 = vld [vmem:[#allocation8 + $0x28] sm:$0xff]  }
  0x7d   :  { %700 = vmatprep.mubr.msk.bf16.mxu0 %vm903_vm0, %v902_v0  ;;  %685 = vmatpush3.bf16.msra.mxu0 %v733_v4 }
  0x7e   :  { %686 = vmatprep.subr.bf16.mxu0 %v902_v0 }
  0x81   :  { %687 = vmatpush3.bf16.msra.mxu0 %v734_v5 }
  0x82   :  { %688 = vmatprep.subr.bf16.mxu0 %v902_v0 }
  0x85   :  { %689 = vmatpush3.bf16.msra.mxu0 %v735_v6  ;;  %v615_v6 = vld [vmem:[#allocation10 + $0x7] ss:$0 sm:$0xff] }
  0x86   :  { %690 = vmatprep.subr.bf16.mxu0 %v902_v0 }
  0x89   :  { %691 = vmatpush3.bf16.msra.mxu0 %v736_v7 }
  0x8a   :  { %692 = vmatprep.subr.bf16.mxu0 %v902_v0 }
  0x8d   :  { %693 = vmatpush3.bf16.msra.mxu0 %v737_v8 }
  0x8e   :  { %694 = vmatprep.subr.bf16.mxu0 %v902_v0 }
  0x91   :  { %695 = vmatpush3.bf16.msra.mxu0 %v738_v9 }
  0x92   :  { %696 = vmatprep.subr.bf16.mxu0 %v902_v0 }
 0x14f   :  { %v201_v11 = vpop.f32.mrb[0].mxu0 }
 0x150   :  { %v202_v12 = vadd.f32 %v583_v10, %v201_v11  ;;  %v662_v13 = vpop.f32.mrb[1].mxu0  ;;  %v740_v11 = vld [vmem:[#allocation8 + $0x38] sm:$0xff]  }
 0x151   :  { %v204_v14 = vpop.f32.mrb[2].mxu0 }
 0x152   :  { %v205_v15 = vadd.f32 %v583_v10, %v204_v14  ;;  %208 = vadd.xlane.f32.xlu0 %v202_v12  ;;  %v663_v16 = vpop.f32.mrb[3].mxu0  ;;  %v212_v17 = vmul.f32 %v202_v12, %v202_v12  ;;  %v739_v10 = vld [vmem:[#allocation8 + $0x30] sm:$0xff]  }
 0x153   :  { %697 = vmatpush3.bf16.msra.mxu0 %v739_v10  ;;  %v616_v10 = vld [vmem:[#allocation10 + $0x8] ss:$0 sm:$0xff] }
 0x154   :  { %214 = vadd.xlane.f32.xlu1 %v212_v17  ;;  %v213_v18 = vmul.f32 %v205_v15, %v205_v15  ;;  %698 = vmatprep.subr.bf16.mxu0 %v902_v0 }
 0x156   :  { %210 = vadd.xlane.f32.xlu0 %v205_v15 }
 0x157   :  { %699 = vmatpush3.bf16.msra.mxu0 %v740_v11 }
 0x158   :  { %216 = vadd.xlane.f32.xlu1 %v213_v18 }
 0x1df   :  { %v209_v27 = vpop.xlane.xlu0 %208 }
 0x1e0   :  { %v218_v28 = vmul.f32 0.03125, %v209_v27 }
 0x1e1   :  { %v215_v29 = vpop.xlane.xlu1 %214 }
 0x1e2   :  { %v222_v30 = vmul.f32 %v218_v28, %v218_v28  ;;  %v220_v31 = vmul.f32 0.03125, %v215_v29  ;;  %v228_v43 = vsub.f32 %v202_v12, %v218_v28  ;;  %v604_v29 = vld [vmem:[#allocation10 + $0x4] ss:$0 sm:$0xff] }
 0x1e3   :  { %v211_v32 = vpop.xlane.xlu0 %210 }
 0x1e4   :  { %v224_v33 = vsub.f32 %v220_v31, %v222_v30  ;;  %v219_v34 = vmul.f32 0.03125, %v211_v32 }
 0x1e5   :  { %v217_v35 = vpop.xlane.xlu1 %216 }
 0x1e6   :  { %v226_v36 = vmax.f32 %v224_v33, 0.0  ;;  %v223_v37 = vmul.f32 %v219_v34, %v219_v34  ;;  %v221_v38 = vmul.f32 0.03125, %v217_v35  ;;  %v229_v47 = vsub.f32 %v205_v15, %v219_v34  ;;  %v605_v33 = vld [vmem:[#allocation10 + $0x5] ss:$0 sm:$0xff] }
 0x1e8   :  { %v230_v39 = vadd.f32 1e-05, %v226_v36  ;;  %v225_v40 = vsub.f32 %v221_v38, %v223_v37 }
 0x1ea   :  { %741 = vrsqrt.f32 %v230_v39  ;;  %v227_v41 = vmax.f32 %v225_v40, 0.0 }
 0x1ec   :  { %v231_v42 = vadd.f32 1e-05, %v227_v41 }
 0x1ee   :  { %743 = vrsqrt.f32 %v231_v42  ;;  %v606_v42 = vld [vmem:[#allocation10 + $0x6] ss:$0 sm:$0xff] }
 0x1f4   :  { %v742_v44 = vpop.eup %741 }
 0x1f5   :  { %v234_v46 = vmul.f32 %v742_v44, %v228_v43 }
 0x1f7   :  { %v241_v48 = vmul.f32 %v593_v45, %v234_v46 }
 0x1f8   :  { %v744_v49 = vpop.eup %743 }
 0x1f9   :  { %v235_v51 = vmul.f32 %v744_v49, %v229_v47  ;;  %v248_v53 = vadd.f32 %v594_v50, %v241_v48 }
 0x1fb   :  { %v242_v52 = vmul.f32 %v593_v45, %v235_v51  ;;  %v250_v55 = vmax.f32 %v248_v53, 0.0 }
 0x1fd   :  { %v249_v54 = vadd.f32 %v594_v50, %v242_v52 }
 0x1ff   :  { %v251_v56 = vmax.f32 %v249_v54, 0.0 }
 0x201   :  { %v252_v57 = vpack.c.bf16 %v251_v56, %v250_v55 }
 0x203   :  { %681 = vmatmul.mubr.bf16.vlgmr.msra.gmra.mrb[0].mxu1 %v252_v57 }
 0x2d6   :  { %v356_v59 = vpop.f32.mrb[0].mxu1 }
 0x2d7   :  { %v357_v60 = vadd.f32 %v595_v58, %v356_v59  ;;  %v682_v61 = vpop.f32.mrb[1].mxu1 }
 0x2d8   :  { %v359_v62 = vpop.f32.mrb[2].mxu1 }
 0x2d9   :  { %v360_v63 = vadd.f32 %v595_v58, %v359_v62  ;;  %363 = vadd.xlane.f32.xlu0 %v357_v60  ;;  %v683_v1 = vpop.f32.mrb[3].mxu1  ;;  %v367_v2 = vmul.f32 %v357_v60, %v357_v60 }
 0x2db   :  { %365 = vadd.xlane.f32.xlu1 %v360_v63  ;;  %v368_v3 = vmul.f32 %v360_v63, %v360_v63 }
 0x2dd   :  { %369 = vadd.xlane.f32.xlu0 %v367_v2 }
 0x2df   :  { %371 = vadd.xlane.f32.xlu1 %v368_v3 }
 0x366   :  { %v364_v12 = vpop.xlane.xlu0 %363 }
 0x367   :  { %v373_v13 = vmul.f32 0.03125, %v364_v12 }
 0x368   :  { %v366_v14 = vpop.xlane.xlu1 %365 }
 0x369   :  { %v374_v15 = vmul.f32 0.03125, %v366_v14  ;;  %v377_v17 = vmul.f32 %v373_v13, %v373_v13  ;;  %v383_v0 = vsub.f32 %v357_v60, %v373_v13 }
 0x36a   :  { %v370_v16 = vpop.xlane.xlu0 %369 }
 0x36b   :  { %v375_v18 = vmul.f32 0.03125, %v370_v16  ;;  %v378_v20 = vmul.f32 %v374_v15, %v374_v15  ;;  %v384_v30 = vsub.f32 %v360_v63, %v374_v15 }
 0x36c   :  { %v372_v19 = vpop.xlane.xlu1 %371 }
 0x36d   :  { %v379_v21 = vsub.f32 %v375_v18, %v377_v17  ;;  %v376_v22 = vmul.f32 0.03125, %v372_v19 }
 0x36f   :  { %v381_v23 = vmax.f32 %v379_v21, 0.0  ;;  %v380_v24 = vsub.f32 %v376_v22, %v378_v20 }
 0x371   :  { %v385_v25 = vadd.f32 1e-05, %v381_v23  ;;  %v382_v26 = vmax.f32 %v380_v24, 0.0 }
 0x373   :  { %745 = vrsqrt.f32 %v385_v25  ;;  %v386_v27 = vadd.f32 1e-05, %v382_v26 }
 0x375   :  { %747 = vrsqrt.f32 %v386_v27 }
 0x37d   :  { %v746_v28 = vpop.eup %745 }
 0x37e   :  { %v389_v31 = vmul.f32 %v746_v28, %v383_v0 }
 0x37f   :  { %v748_v32 = vpop.eup %747 }
 0x380   :  { %v390_v34 = vmul.f32 %v748_v32, %v384_v30  ;;  %v396_v35 = vmul.f32 %v604_v29, %v389_v31 }
 0x382   :  { %v397_v36 = vmul.f32 %v604_v29, %v390_v34  ;;  %v403_v37 = vadd.f32 %v605_v33, %v396_v35 }
 0x384   :  { %v404_v38 = vadd.f32 %v605_v33, %v397_v36  ;;  %v405_v39 = vmax.f32 %v403_v37, 0.0 }
 0x386   :  { %v406_v40 = vmax.f32 %v404_v38, 0.0 }
 0x388   :  { %v407_v41 = vpack.c.bf16 %v406_v40, %v405_v39 }
 0x38a   :  { %701 = vmatmul.mubr.bf16.vlgmr.msra.gmra.mrb[4].mxu0 %v407_v41 }
 0x45d   :  { %v511_v43 = vpop.f32.mrb[4].mxu0 }
 0x45e   :  { %v512_v44 = vadd.f32 %v606_v42, %v511_v43  ;;  %v702_v45 = vpop.f32.mrb[5].mxu0 }
 0x45f   :  { %v514_v46 = vpop.f32.mrb[6].mxu0 }
 0x460   :  { %v515_v47 = vadd.f32 %v606_v42, %v514_v46  ;;  %518 = vadd.xlane.f32.xlu0 %v512_v44  ;;  %v703_v48 = vpop.f32.mrb[7].mxu0  ;;  %v522_v49 = vmul.f32 %v512_v44, %v512_v44 }
 0x462   :  { %520 = vadd.xlane.f32.xlu1 %v515_v47  ;;  %v523_v50 = vmul.f32 %v515_v47, %v515_v47 }
 0x464   :  { %524 = vadd.xlane.f32.xlu0 %v522_v49 }
 0x466   :  { %526 = vadd.xlane.f32.xlu1 %v523_v50 }
 0x4ed   :  { %v519_v51 = vpop.xlane.xlu0 %518 }
 0x4ee   :  { %v528_v52 = vmul.f32 0.03125, %v519_v51 }
 0x4ef   :  { %v521_v53 = vpop.xlane.xlu1 %520 }
 0x4f0   :  { %v529_v54 = vmul.f32 0.03125, %v521_v53  ;;  %v532_v56 = vmul.f32 %v528_v52, %v528_v52  ;;  %v538_v4 = vsub.f32 %v512_v44, %v528_v52 }
 0x4f1   :  { %v525_v55 = vpop.xlane.xlu0 %524 }
 0x4f2   :  { %v530_v57 = vmul.f32 0.03125, %v525_v55  ;;  %v533_v59 = vmul.f32 %v529_v54, %v529_v54  ;;  %v539_v7 = vsub.f32 %v515_v47, %v529_v54 }
 0x4f3   :  { %v527_v58 = vpop.xlane.xlu1 %526 }
 0x4f4   :  { %v534_v60 = vsub.f32 %v530_v57, %v532_v56  ;;  %v531_v61 = vmul.f32 0.03125, %v527_v58 }
 0x4f6   :  { %v536_v62 = vmax.f32 %v534_v60, 0.0  ;;  %v535_v63 = vsub.f32 %v531_v61, %v533_v59 }
 0x4f8   :  { %v540_v1 = vadd.f32 1e-05, %v536_v62  ;;  %v537_v2 = vmax.f32 %v535_v63, 0.0 }
 0x4fa   :  { %749 = vrsqrt.f32 %v540_v1  ;;  %v541_v3 = vadd.f32 1e-05, %v537_v2 }
 0x4fc   :  { %751 = vrsqrt.f32 %v541_v3 }
 0x504   :  { %v750_v5 = vpop.eup %749 }
 0x505   :  { %v544_v8 = vmul.f32 %v750_v5, %v538_v4 }
 0x506   :  { %v752_v9 = vpop.eup %751 }
 0x507   :  { %v545_v11 = vmul.f32 %v752_v9, %v539_v7  ;;  %v551_v12 = vmul.f32 %v615_v6, %v544_v8 }
 0x509   :  { %v552_v13 = vmul.f32 %v615_v6, %v545_v11  ;;  %v558_v14 = vadd.f32 %v616_v10, %v551_v12 }
 0x50b   :  { %v559_v15 = vadd.f32 %v616_v10, %v552_v13  ;;  %v560_v16 = vmax.f32 %v558_v14, 0.0 }
 0x50d   :  { %v561_v17 = vmax.f32 %v559_v15, 0.0  ;;  %562 = vst [vmem:[#allocation11] sm:$0xff] %v560_v16 }
 0x50f   :  { %563 = vst [vmem:[#allocation11 + $0x8] sm:$0xff] %v561_v17 }
 0x510   :  { %874 = shalt.err (!%p871_p2)
}
 0x511   :  { %s875_s7 = scalar_lea.hbm %s1074_s5, 256 }
 0x512   :  { %p876_p3 = scmp.ne.s32.totalorder %s1074_s5, %s875_s7  ;;  %p879_p4 = scmp.lt.u32.totalorder %s875_s7, %s1074_s5 }
 0x514   :  { %p881_p5 = pnand %p879_p4, %p876_p3 }
 0x516   :  { %884 = shalt.err (!%p881_p5)
}
 0x517   :  { %575 = dma.vmem_to_hbm [thread:$0]  %s570_s28, 256, %s1074_s5, [#allocation4], %s900_s2, %s900_s2, %s901_s30  }
 0x518   :  { %891 = dma.done.wait [#allocation4], 256  }
 0x519   :  { %892 = vsyncadd [#allocation4], 4294967040 }
 0x51a   :  { %579 = vsyncpa [#allocation3], 1 }
 0x51b   :  { %580 = vsyncpa [#allocation6], 1 }
 0x51c   :  { %581 = vsyncpa [#allocation9], 1 }
 0x51d   :  { %582 = vsyncpa [#allocation4], 1 }

</bundles_post_ra>
